<compile_context>
chip_gen: v6e
topology: v6e:2x2x1
jax: 0.10.0
libtpu: 0.0.40
codegen_flags: <defaults>
</compile_context>

<pallas_src>
import functools
from math import gcd

import jax
import jax.numpy as jnp
from jax import lax
from jax.experimental import pallas as pl
from jax.experimental.pallas import tpu as pltpu

EPS = 1e-5  # torch.nn.GroupNorm default


def _round_up(v, m):
    return ((v + m - 1) // m) * m


def _vmem_capacity_bytes():
    """Per-core VMEM capacity; conservative fallback if the query fails."""
    try:
        info = pltpu.get_tpu_info()
        cap = getattr(info, "vmem_capacity_bytes", None)
        if cap:
            return int(cap)
    except Exception:
        pass
    return 64 * 1024 * 1024  # v7x per-TC VMEM (smallest supported generation)


def _group_scale_shift(out_f32, gamma, beta, gmat, gmat_t, inv_group_size):
    """Per-sample GroupNorm folded into per-channel (scale, shift).

    Stats via group one-hot matmuls (correct for any group size). Two small
    stats GEMMs are issued separately (no (2bn, C) sublane concat); rsqrt runs
    only on the tiny (bn, G) tensor (EUP); the two broadcast-back matmuls stay
    fused through a tiny (2bn, G) concat.
    """
    bn = out_f32.shape[0]
    mean_g = jnp.dot(out_f32, gmat, preferred_element_type=jnp.float32) * inv_group_size
    ex2_g = jnp.dot(out_f32 * out_f32, gmat,
                    preferred_element_type=jnp.float32) * inv_group_size
    var_g = jnp.maximum(ex2_g - mean_g * mean_g, 0.0)   # clamp f32 cancellation
    inv_std_g = lax.rsqrt(var_g + EPS)                  # EUP, (bn, G) only
    shift_g = -mean_g * inv_std_g
    packed = jnp.concatenate([inv_std_g, shift_g], axis=0)              # (2bn, G) tiny
    full = jnp.dot(packed, gmat_t, preferred_element_type=jnp.float32)  # (2bn, C)
    scale = full[:bn] * gamma
    shift = full[bn:] * gamma + beta
    return scale, shift


def _linear_res_kernel(x_ref, w1_ref, w2_ref, aff_ref, gmat_ref, gmat_t_ref, o_ref,
                       *, inv_group_size, has_transform, n_out):
    mm_dtype = w1_ref.dtype
    gmat = gmat_ref[...]
    gmat_t = gmat_t_ref[...]
    aff = aff_ref[...]
    g1, b1 = aff[0:1], aff[1:2]
    g2, b2 = aff[2:3], aff[3:4]

    x = x_ref[...]
    x_mm = x.astype(mm_dtype)          # cast in VMEM (no wrapper pre-cast pass)

    # Stage 1 (+ transform): single merged GEMM x @ [W1 | Wt] fills all MXU
    # output lanes and halves push/drain count for the x-GEMMs.
    out1t = jnp.dot(x_mm, w1_ref[...], preferred_element_type=jnp.float32)
    out1 = out1t[:, :n_out] if has_transform else out1t

    s1, t1 = _group_scale_shift(out1, g1, b1, gmat, gmat_t, inv_group_size)
    h = jnp.maximum(out1 * s1 + t1, 0.0)

    # Stage 2: Linear -> GN.
    out2 = jnp.dot(h.astype(mm_dtype), w2_ref[...],
                   preferred_element_type=jnp.float32)
    s2, t2 = _group_scale_shift(out2, g2, b2, gmat, gmat_t, inv_group_size)
    y2 = out2 * s2 + t2

    # Residual branch.
    if has_transform:
        outt = out1t[:, n_out:]
        gt, bt = aff[4:5], aff[5:6]
        st, tt = _group_scale_shift(outt, gt, bt, gmat, gmat_t, inv_group_size)
        res = outt * st + tt
    else:
        res = x.astype(jnp.float32)

    o_ref[...] = jnp.maximum(y2 + res, 0.0).astype(o_ref.dtype)


def prepare_linear_res_params(w1_t, w2_t, gamma1, beta1, gamma2, beta2,
                              wt_t=None, gammat=None, betat=None, *,
                              ng=32, compute_dtype=jnp.bfloat16):
    """One-time param prep hoisted out of the hot path.

    w1_t: (n_in, n_out); w2_t: (n_out, n_out); wt_t: (n_in, n_out) or None.
    Casts weights to compute_dtype, merges [W1 | Wt], packs the affine
    vectors into one (8, n_out) array and builds the group one-hot matrices.
    """
    n_in, n_out = w1_t.shape
    has_transform = wt_t is not None
    assert has_transform == (n_in != n_out), \
        "transform branch must be present iff n_in != n_out"
    num_groups = gcd(ng, n_out)          # matches the PyTorch module's gcd(ng, n_out)
    group_size = n_out // num_groups

    if has_transform:
        w1m = jnp.concatenate([jnp.asarray(w1_t), jnp.asarray(wt_t)], axis=1)
    else:
        w1m = jnp.asarray(w1_t)
    w1m = w1m.astype(compute_dtype)
    w2 = jnp.asarray(w2_t).astype(compute_dtype)

    rows = [gamma1, beta1, gamma2, beta2]
    if has_transform:
        rows += [gammat, betat]
    rows = [jnp.asarray(r).reshape(n_out).astype(jnp.float32) for r in rows]
    aff = jnp.zeros((8, n_out), jnp.float32).at[:len(rows)].set(jnp.stack(rows))

    ch = jnp.arange(n_out)
    gmat = (ch[:, None] // group_size
            == jnp.arange(num_groups)[None, :]).astype(jnp.float32)

    return dict(w1m=w1m, w2=w2, aff=aff, gmat=gmat, gmat_t=gmat.T,
                n_in=n_in, n_out=n_out, num_groups=num_groups,
                group_size=group_size, has_transform=has_transform,
                compute_dtype=compute_dtype)


def linear_res(x, params, *, block_n=256):
    """Fused LinearRes forward (GroupNorm variant).  x: (N, n_in)."""
    N, n_in = x.shape
    assert n_in == params["n_in"]
    n_out = params["n_out"]
    has_transform = params["has_transform"]
    compute_dtype = params["compute_dtype"]
    num_groups = params["num_groups"]
    group_size = params["group_size"]
    w1m, w2, aff = params["w1m"], params["w2"], params["aff"]
    gmat, gmat_t = params["gmat"], params["gmat_t"]

    x_bytes = jnp.dtype(x.dtype).itemsize
    mm_bytes = jnp.dtype(compute_dtype).itemsize
    n1 = w1m.shape[1]  # n_out or 2*n_out (merged)

    def est_vmem(bn):
        weights = (w1m.size + w2.size) * mm_bytes               # Buffered(1)
        consts = (aff.size + gmat.size + gmat_t.size) * 4       # Buffered(1)
        io = bn * n_in * x_bytes + bn * n_out * x_bytes          # per pipeline buf
        tmp = (bn * n1 + 6 * bn * n_out) * 4                     # live f32 temps
        tmp += bn * max(n_in, n_out) * mm_bytes                  # bf16 matmul operands
        return weights + consts + 2 * io + tmp                   # x/out double-buffered

    # Per-generation budget: ~54 MiB on v7x, ~109 MiB on v5e/v6e.
    vmem_budget = int(0.85 * _vmem_capacity_bytes())

    # bf16 packs 2 rows/sublane -> batch tile must be a multiple of 16.
    row_align = 16 if mm_bytes == 2 else 8
    block_n_eff = max(row_align,
                      min(_round_up(block_n, row_align), _round_up(N, row_align)))
    while block_n_eff > row_align and est_vmem(block_n_eff) > vmem_budget:
        block_n_eff = max(row_align, _round_up(block_n_eff // 2, row_align))
    # Split across both v7x TensorCores only when each half stays MXU-sized.
    if pl.cdiv(N, block_n_eff) < 2:
        half = _round_up(pl.cdiv(N, 2), row_align)
        if half >= 128:
            block_n_eff = min(block_n_eff, half)
    # TODO(synk): add a K/N-tiled accumulator fallback (extra 'arbitrary' grid
    # axis + f32 VMEM accumulator with pl.when init/finalize) for channel sizes
    # where resident weights alone exceed the VMEM budget (v7x, 64 MiB).

    kernel = functools.partial(
        _linear_res_kernel,
        inv_group_size=1.0 / float(group_size),
        has_transform=has_transform,
        n_out=n_out)

    vmem_limit = int(min(vmem_budget,
                         max(32 * 1024 * 1024,
                             est_vmem(block_n_eff) + (8 << 20))))

    flops = 2 * N * (n_in * n1 + n_out * n_out)                          # main GEMMs
    flops += (3 if has_transform else 2) * 4 * N * n_out * num_groups    # GN matmuls
    bytes_accessed = (N * n_in * x_bytes + N * n_out * x_bytes
                      + (w1m.size + w2.size) * mm_bytes
                      + (aff.size + gmat.size + gmat_t.size) * 4)
    cost = pl.CostEstimate(
        flops=int(flops),
        transcendentals=int((3 if has_transform else 2) * N * num_groups),
        bytes_accessed=int(bytes_accessed))

    def build_and_run(single_buffer_consts):
        pipe = {"pipeline_mode": pl.Buffered(1)} if single_buffer_consts else {}

        def const_spec(shape):  # grid-invariant input
            return pl.BlockSpec(shape, lambda i: (0, 0), **pipe)

        in_specs = [pl.BlockSpec((block_n_eff, n_in), lambda i: (i, 0)),
                    const_spec(w1m.shape), const_spec(w2.shape),
                    const_spec(aff.shape), const_spec(gmat.shape),
                    const_spec(gmat_t.shape)]
        return pl.pallas_call(
            kernel,
            out_shape=jax.ShapeDtypeStruct((N, n_out), x.dtype),
            grid_spec=pltpu.PrefetchScalarGridSpec(
                num_scalar_prefetch=0,
                grid=(pl.cdiv(N, block_n_eff),),   # ragged last tile is masked
                in_specs=in_specs,
                out_specs=pl.BlockSpec((block_n_eff, n_out), lambda i: (i, 0)),
            ),
            compiler_params=pltpu.CompilerParams(
                dimension_semantics=("parallel",),
                vmem_limit_bytes=vmem_limit,
            ),
            cost_estimate=cost,
        )(x, w1m, w2, aff, gmat, gmat_t)

    try:
        return build_and_run(True)
    except Exception:
        # Fallback if this toolchain rejects pl.Buffered(1): default buffering.
        return build_and_run(False)


if __name__ == "__main__":
    key = jax.random.PRNGKey(0)

    def make_params(k, n_in, n_out, with_transform):
        ks = jax.random.split(k, 9)
        b1 = 1.0 / jnp.sqrt(n_in)
        b2 = 1.0 / jnp.sqrt(n_out)
        w1 = jax.random.uniform(ks[0], (n_out, n_in), minval=-b1, maxval=b1, dtype=jnp.float32)
        w2 = jax.random.uniform(ks[1], (n_out, n_out), minval=-b2, maxval=b2, dtype=jnp.float32)
        g1 = 1.0 + 0.1 * jax.random.normal(ks[2], (n_out,), dtype=jnp.float32)
        be1 = 0.1 * jax.random.normal(ks[3], (n_out,), dtype=jnp.float32)
        g2 = 1.0 + 0.1 * jax.random.normal(ks[4], (n_out,), dtype=jnp.float32)
        be2 = 0.1 * jax.random.normal(ks[5], (n_out,), dtype=jnp.float32)
        if with_transform:
            wt = jax.random.uniform(ks[6], (n_out, n_in), minval=-b1, maxval=b1, dtype=jnp.float32)
            gt = 1.0 + 0.1 * jax.random.normal(ks[7], (n_out,), dtype=jnp.float32)
            bt = 0.1 * jax.random.normal(ks[8], (n_out,), dtype=jnp.float32)
        else:
            wt = gt = bt = None
        return w1, w2, g1, be1, g2, be2, wt, gt, bt

    def gn_ref(v, gamma, beta, groups):
        Nn, C = v.shape
        g = v.reshape(Nn, groups, C // groups)
        mu = jnp.mean(g, axis=-1, keepdims=True)
        var = jnp.mean((g - mu) ** 2, axis=-1, keepdims=True)
        return ((g - mu) * lax.rsqrt(var + EPS)).reshape(Nn, C) * gamma + beta

    def ref_forward(xv, torch_params, ngv, cd):
        w1, w2, g1, be1, g2, be2, wt, gt, bt = torch_params
        n_out = w1.shape[0]
        G = gcd(ngv, n_out)
        xm = xv.astype(cd)
        o1 = jnp.dot(xm, w1.T.astype(cd), preferred_element_type=jnp.float32)
        h = jnp.maximum(gn_ref(o1, g1, be1, G), 0.0)
        o2 = jnp.dot(h.astype(cd), w2.T.astype(cd), preferred_element_type=jnp.float32)
        y2 = gn_ref(o2, g2, be2, G)
        if wt is not None:
            ot = jnp.dot(xm, wt.T.astype(cd), preferred_element_type=jnp.float32)
            res = gn_ref(ot, gt, bt, G)
        else:
            res = xv
        return jnp.maximum(y2 + res, 0.0)

    cases = [
        dict(N=16, n_in=64, n_out=128),    # n_in != n_out -> transform residual
        dict(N=16, n_in=128, n_out=128),   # n_in == n_out -> identity residual
    ]
    for idx, c in enumerate(cases):
        kx, kp, key = jax.random.split(key, 3)
        N, n_in, n_out = c["N"], c["n_in"], c["n_out"]
        x = jax.random.normal(kx, (N, n_in), dtype=jnp.float32)
        tparams = make_params(kp, n_in, n_out, with_transform=(n_in != n_out))
        w1, w2, g1, be1, g2, be2, wt, gt, bt = tparams

        params = prepare_linear_res_params(
            w1.T, w2.T, g1, be1, g2, be2,
            wt_t=None if wt is None else wt.T, gammat=gt, betat=bt,
            ng=32, compute_dtype=jnp.bfloat16)

        out = linear_res(x, params, block_n=256)
        out = jax.block_until_ready(out)

        ref = ref_forward(x, tparams, 32, jnp.bfloat16)
        assert out.shape == ref.shape
        assert bool(jnp.all(jnp.isfinite(out))), f"non-finite output in case {idx}"
        assert jnp.allclose(out, ref, atol=5e-2, rtol=5e-2), f"mismatch vs reference in case {idx}"

    print("KERNEL_OK")
</pallas_src>

<mosaic_0001>
module attributes {stable_mosaic.version = 11 : i64} {
  func.func @_linear_res_kernel(%arg0: i32, %arg1: memref<16x64xf32, #tpu.memory_space<vmem>>, %arg2: memref<64x256xbf16, #tpu.memory_space<vmem>>, %arg3: memref<128x128xbf16, #tpu.memory_space<vmem>>, %arg4: memref<8x128xf32, #tpu.memory_space<vmem>>, %arg5: memref<128x32xf32, #tpu.memory_space<vmem>>, %arg6: memref<32x128xf32, #tpu.memory_space<vmem>>, %arg7: memref<16x128xf32, #tpu.memory_space<vmem>>) attributes {dimension_semantics = [#tpu.dimension_semantics<parallel>], iteration_bounds = array<i64: 1>, scalar_prefetch = 0 : i64, scratch_operands = 0 : i64, tpu.core_type = #tpu.core_type<tc>, window_params = [{transform_indices = @transform_0, window_bounds = array<i64: 16, 64>}, {pipeline_mode = #tpu.pipeline_mode<synchronous>, transform_indices = @transform_1, window_bounds = array<i64: 64, 256>}, {pipeline_mode = #tpu.pipeline_mode<synchronous>, transform_indices = @transform_2, window_bounds = array<i64: 128, 128>}, {pipeline_mode = #tpu.pipeline_mode<synchronous>, transform_indices = @transform_3, window_bounds = array<i64: 8, 128>}, {pipeline_mode = #tpu.pipeline_mode<synchronous>, transform_indices = @transform_4, window_bounds = array<i64: 128, 32>}, {pipeline_mode = #tpu.pipeline_mode<synchronous>, transform_indices = @transform_5, window_bounds = array<i64: 32, 128>}, {transform_indices = @transform_6, window_bounds = array<i64: 16, 128>}]} {
    %c0 = arith.constant 0 : index
    %c0_0 = arith.constant 0 : index
    %0 = vector.load %arg5[%c0, %c0_0] : memref<128x32xf32, #tpu.memory_space<vmem>>, vector<128x32xf32>
    %c0_1 = arith.constant 0 : index
    %c0_2 = arith.constant 0 : index
    %1 = vector.load %arg6[%c0_1, %c0_2] : memref<32x128xf32, #tpu.memory_space<vmem>>, vector<32x128xf32>
    %c0_3 = arith.constant 0 : index
    %c0_4 = arith.constant 0 : index
    %2 = vector.load %arg4[%c0_3, %c0_4] : memref<8x128xf32, #tpu.memory_space<vmem>>, vector<8x128xf32>
    %3 = vector.extract_strided_slice %2 {offsets = [0, 0], sizes = [1, 128], strides = [1, 1]} : vector<8x128xf32> to vector<1x128xf32>
    %4 = vector.extract_strided_slice %2 {offsets = [1, 0], sizes = [1, 128], strides = [1, 1]} : vector<8x128xf32> to vector<1x128xf32>
    %5 = vector.extract_strided_slice %2 {offsets = [2, 0], sizes = [1, 128], strides = [1, 1]} : vector<8x128xf32> to vector<1x128xf32>
    %6 = vector.extract_strided_slice %2 {offsets = [3, 0], sizes = [1, 128], strides = [1, 1]} : vector<8x128xf32> to vector<1x128xf32>
    %c0_5 = arith.constant 0 : index
    %c0_6 = arith.constant 0 : index
    %7 = vector.load %arg1[%c0_5, %c0_6] : memref<16x64xf32, #tpu.memory_space<vmem>>, vector<16x64xf32>
    %8 = arith.truncf %7 : vector<16x64xf32> to vector<16x64xbf16>
    %c0_7 = arith.constant 0 : index
    %c0_8 = arith.constant 0 : index
    %9 = vector.load %arg2[%c0_7, %c0_8] : memref<64x256xbf16, #tpu.memory_space<vmem>>, vector<64x256xbf16>
    %cst = arith.constant dense<0.000000e+00> : vector<16x256xf32>
    %10 = tpu.matmul %8, %9, %cst {dimension_numbers = #tpu.dot_dimension_numbers<[1], [0], [0], [1], [0, 0, 1, 1], [], []>} : vector<16x64xbf16>, vector<64x256xbf16>, vector<16x256xf32> -> vector<16x256xf32>
    %11 = vector.extract_strided_slice %10 {offsets = [0, 0], sizes = [16, 128], strides = [1, 1]} : vector<16x256xf32> to vector<16x128xf32>
    %cst_9 = arith.constant dense<0.000000e+00> : vector<16x32xf32>
    %12 = tpu.matmul %11, %0, %cst_9 {dimension_numbers = #tpu.dot_dimension_numbers<[1], [0], [0], [1], [0, 0, 1, 1], [], []>} : vector<16x128xf32>, vector<128x32xf32>, vector<16x32xf32> -> vector<16x32xf32>
    %cst_10 = arith.constant 2.500000e-01 : f32
    %13 = vector.broadcast %cst_10 : f32 to vector<16x32xf32>
    %14 = arith.mulf %12, %13 : vector<16x32xf32>
    %15 = arith.mulf %11, %11 : vector<16x128xf32>
    %cst_11 = arith.constant dense<0.000000e+00> : vector<16x32xf32>
    %16 = tpu.matmul %15, %0, %cst_11 {dimension_numbers = #tpu.dot_dimension_numbers<[1], [0], [0], [1], [0, 0, 1, 1], [], []>} : vector<16x128xf32>, vector<128x32xf32>, vector<16x32xf32> -> vector<16x32xf32>
    %cst_12 = arith.constant 2.500000e-01 : f32
    %17 = vector.broadcast %cst_12 : f32 to vector<16x32xf32>
    %18 = arith.mulf %16, %17 : vector<16x32xf32>
    %19 = arith.mulf %14, %14 : vector<16x32xf32>
    %20 = arith.subf %18, %19 : vector<16x32xf32>
    %cst_13 = arith.constant 0.000000e+00 : f32
    %21 = vector.broadcast %cst_13 : f32 to vector<16x32xf32>
    %22 = arith.maximumf %20, %21 : vector<16x32xf32>
    %cst_14 = arith.constant 9.99999974E-6 : f32
    %23 = vector.broadcast %cst_14 : f32 to vector<16x32xf32>
    %24 = arith.addf %22, %23 : vector<16x32xf32>
    %25 = math.rsqrt %24 : vector<16x32xf32>
    %cst_15 = arith.constant 0.000000e+00 : f32
    %26 = vector.broadcast %cst_15 : f32 to vector<16x32xf32>
    %27 = arith.subf %26, %14 : vector<16x32xf32>
    %28 = arith.mulf %27, %25 : vector<16x32xf32>
    %29 = tpu.concatenate %25, %28 in 0 : vector<16x32xf32>, vector<16x32xf32> -> vector<32x32xf32>
    %cst_16 = arith.constant dense<0.000000e+00> : vector<32x128xf32>
    %30 = tpu.matmul %29, %1, %cst_16 {dimension_numbers = #tpu.dot_dimension_numbers<[1], [0], [0], [1], [0, 0, 1, 1], [], []>} : vector<32x32xf32>, vector<32x128xf32>, vector<32x128xf32> -> vector<32x128xf32>
    %31 = vector.extract_strided_slice %30 {offsets = [0, 0], sizes = [16, 128], strides = [1, 1]} : vector<32x128xf32> to vector<16x128xf32>
    %32 = vector.broadcast %3 : vector<1x128xf32> to vector<16x128xf32>
    %33 = arith.mulf %31, %32 : vector<16x128xf32>
    %34 = vector.extract_strided_slice %30 {offsets = [16, 0], sizes = [16, 128], strides = [1, 1]} : vector<32x128xf32> to vector<16x128xf32>
    %35 = vector.broadcast %3 : vector<1x128xf32> to vector<16x128xf32>
    %36 = arith.mulf %34, %35 : vector<16x128xf32>
    %37 = vector.broadcast %4 : vector<1x128xf32> to vector<16x128xf32>
    %38 = arith.addf %36, %37 : vector<16x128xf32>
    %39 = arith.mulf %11, %33 : vector<16x128xf32>
    %40 = arith.addf %39, %38 : vector<16x128xf32>
    %cst_17 = arith.constant 0.000000e+00 : f32
    %41 = vector.broadcast %cst_17 : f32 to vector<16x128xf32>
    %42 = arith.maximumf %40, %41 : vector<16x128xf32>
    %43 = arith.truncf %42 : vector<16x128xf32> to vector<16x128xbf16>
    %c0_18 = arith.constant 0 : index
    %c0_19 = arith.constant 0 : index
    %44 = vector.load %arg3[%c0_18, %c0_19] : memref<128x128xbf16, #tpu.memory_space<vmem>>, vector<128x128xbf16>
    %cst_20 = arith.constant dense<0.000000e+00> : vector<16x128xf32>
    %45 = tpu.matmul %43, %44, %cst_20 {dimension_numbers = #tpu.dot_dimension_numbers<[1], [0], [0], [1], [0, 0, 1, 1], [], []>} : vector<16x128xbf16>, vector<128x128xbf16>, vector<16x128xf32> -> vector<16x128xf32>
    %cst_21 = arith.constant dense<0.000000e+00> : vector<16x32xf32>
    %46 = tpu.matmul %45, %0, %cst_21 {dimension_numbers = #tpu.dot_dimension_numbers<[1], [0], [0], [1], [0, 0, 1, 1], [], []>} : vector<16x128xf32>, vector<128x32xf32>, vector<16x32xf32> -> vector<16x32xf32>
    %cst_22 = arith.constant 2.500000e-01 : f32
    %47 = vector.broadcast %cst_22 : f32 to vector<16x32xf32>
    %48 = arith.mulf %46, %47 : vector<16x32xf32>
    %49 = arith.mulf %45, %45 : vector<16x128xf32>
    %cst_23 = arith.constant dense<0.000000e+00> : vector<16x32xf32>
    %50 = tpu.matmul %49, %0, %cst_23 {dimension_numbers = #tpu.dot_dimension_numbers<[1], [0], [0], [1], [0, 0, 1, 1], [], []>} : vector<16x128xf32>, vector<128x32xf32>, vector<16x32xf32> -> vector<16x32xf32>
    %cst_24 = arith.constant 2.500000e-01 : f32
    %51 = vector.broadcast %cst_24 : f32 to vector<16x32xf32>
    %52 = arith.mulf %50, %51 : vector<16x32xf32>
    %53 = arith.mulf %48, %48 : vector<16x32xf32>
    %54 = arith.subf %52, %53 : vector<16x32xf32>
    %cst_25 = arith.constant 0.000000e+00 : f32
    %55 = vector.broadcast %cst_25 : f32 to vector<16x32xf32>
    %56 = arith.maximumf %54, %55 : vector<16x32xf32>
    %cst_26 = arith.constant 9.99999974E-6 : f32
    %57 = vector.broadcast %cst_26 : f32 to vector<16x32xf32>
    %58 = arith.addf %56, %57 : vector<16x32xf32>
    %59 = math.rsqrt %58 : vector<16x32xf32>
    %cst_27 = arith.constant 0.000000e+00 : f32
    %60 = vector.broadcast %cst_27 : f32 to vector<16x32xf32>
    %61 = arith.subf %60, %48 : vector<16x32xf32>
    %62 = arith.mulf %61, %59 : vector<16x32xf32>
    %63 = tpu.concatenate %59, %62 in 0 : vector<16x32xf32>, vector<16x32xf32> -> vector<32x32xf32>
    %cst_28 = arith.constant dense<0.000000e+00> : vector<32x128xf32>
    %64 = tpu.matmul %63, %1, %cst_28 {dimension_numbers = #tpu.dot_dimension_numbers<[1], [0], [0], [1], [0, 0, 1, 1], [], []>} : vector<32x32xf32>, vector<32x128xf32>, vector<32x128xf32> -> vector<32x128xf32>
    %65 = vector.extract_strided_slice %64 {offsets = [0, 0], sizes = [16, 128], strides = [1, 1]} : vector<32x128xf32> to vector<16x128xf32>
    %66 = vector.broadcast %5 : vector<1x128xf32> to vector<16x128xf32>
    %67 = arith.mulf %65, %66 : vector<16x128xf32>
    %68 = vector.extract_strided_slice %64 {offsets = [16, 0], sizes = [16, 128], strides = [1, 1]} : vector<32x128xf32> to vector<16x128xf32>
    %69 = vector.broadcast %5 : vector<1x128xf32> to vector<16x128xf32>
    %70 = arith.mulf %68, %69 : vector<16x128xf32>
    %71 = vector.broadcast %6 : vector<1x128xf32> to vector<16x128xf32>
    %72 = arith.addf %70, %71 : vector<16x128xf32>
    %73 = arith.mulf %45, %67 : vector<16x128xf32>
    %74 = arith.addf %73, %72 : vector<16x128xf32>
    %75 = vector.extract_strided_slice %10 {offsets = [0, 128], sizes = [16, 128], strides = [1, 1]} : vector<16x256xf32> to vector<16x128xf32>
    %76 = vector.extract_strided_slice %2 {offsets = [4, 0], sizes = [1, 128], strides = [1, 1]} : vector<8x128xf32> to vector<1x128xf32>
    %77 = vector.extract_strided_slice %2 {offsets = [5, 0], sizes = [1, 128], strides = [1, 1]} : vector<8x128xf32> to vector<1x128xf32>
    %cst_29 = arith.constant dense<0.000000e+00> : vector<16x32xf32>
    %78 = tpu.matmul %75, %0, %cst_29 {dimension_numbers = #tpu.dot_dimension_numbers<[1], [0], [0], [1], [0, 0, 1, 1], [], []>} : vector<16x128xf32>, vector<128x32xf32>, vector<16x32xf32> -> vector<16x32xf32>
    %cst_30 = arith.constant 2.500000e-01 : f32
    %79 = vector.broadcast %cst_30 : f32 to vector<16x32xf32>
    %80 = arith.mulf %78, %79 : vector<16x32xf32>
    %81 = arith.mulf %75, %75 : vector<16x128xf32>
    %cst_31 = arith.constant dense<0.000000e+00> : vector<16x32xf32>
    %82 = tpu.matmul %81, %0, %cst_31 {dimension_numbers = #tpu.dot_dimension_numbers<[1], [0], [0], [1], [0, 0, 1, 1], [], []>} : vector<16x128xf32>, vector<128x32xf32>, vector<16x32xf32> -> vector<16x32xf32>
    %cst_32 = arith.constant 2.500000e-01 : f32
    %83 = vector.broadcast %cst_32 : f32 to vector<16x32xf32>
    %84 = arith.mulf %82, %83 : vector<16x32xf32>
    %85 = arith.mulf %80, %80 : vector<16x32xf32>
    %86 = arith.subf %84, %85 : vector<16x32xf32>
    %cst_33 = arith.constant 0.000000e+00 : f32
    %87 = vector.broadcast %cst_33 : f32 to vector<16x32xf32>
    %88 = arith.maximumf %86, %87 : vector<16x32xf32>
    %cst_34 = arith.constant 9.99999974E-6 : f32
    %89 = vector.broadcast %cst_34 : f32 to vector<16x32xf32>
    %90 = arith.addf %88, %89 : vector<16x32xf32>
    %91 = math.rsqrt %90 : vector<16x32xf32>
    %cst_35 = arith.constant 0.000000e+00 : f32
    %92 = vector.broadcast %cst_35 : f32 to vector<16x32xf32>
    %93 = arith.subf %92, %80 : vector<16x32xf32>
    %94 = arith.mulf %93, %91 : vector<16x32xf32>
    %95 = tpu.concatenate %91, %94 in 0 : vector<16x32xf32>, vector<16x32xf32> -> vector<32x32xf32>
    %cst_36 = arith.constant dense<0.000000e+00> : vector<32x128xf32>
    %96 = tpu.matmul %95, %1, %cst_36 {dimension_numbers = #tpu.dot_dimension_numbers<[1], [0], [0], [1], [0, 0, 1, 1], [], []>} : vector<32x32xf32>, vector<32x128xf32>, vector<32x128xf32> -> vector<32x128xf32>
    %97 = vector.extract_strided_slice %96 {offsets = [0, 0], sizes = [16, 128], strides = [1, 1]} : vector<32x128xf32> to vector<16x128xf32>
    %98 = vector.broadcast %76 : vector<1x128xf32> to vector<16x128xf32>
    %99 = arith.mulf %97, %98 : vector<16x128xf32>
    %100 = vector.extract_strided_slice %96 {offsets = [16, 0], sizes = [16, 128], strides = [1, 1]} : vector<32x128xf32> to vector<16x128xf32>
    %101 = vector.broadcast %76 : vector<1x128xf32> to vector<16x128xf32>
    %102 = arith.mulf %100, %101 : vector<16x128xf32>
    %103 = vector.broadcast %77 : vector<1x128xf32> to vector<16x128xf32>
    %104 = arith.addf %102, %103 : vector<16x128xf32>
    %105 = arith.mulf %75, %99 : vector<16x128xf32>
    %106 = arith.addf %105, %104 : vector<16x128xf32>
    %107 = arith.addf %74, %106 : vector<16x128xf32>
    %cst_37 = arith.constant 0.000000e+00 : f32
    %108 = vector.broadcast %cst_37 : f32 to vector<16x128xf32>
    %109 = arith.maximumf %107, %108 : vector<16x128xf32>
    %c0_38 = arith.constant 0 : index
    %c0_39 = arith.constant 0 : index
    %110 = vector.load %arg7[%c0_38, %c0_39] : memref<16x128xf32, #tpu.memory_space<vmem>>, vector<16x128xf32>
    tpu.vector_store %arg7[%c0_38, %c0_39], %109 {strides = array<i32>} : memref<16x128xf32, #tpu.memory_space<vmem>>, vector<16x128xf32>,
    return
  }
  func.func @transform_0(%arg0: i32) -> (i32, i32) {
    %c0_i32 = arith.constant 0 : i32
    %c0_i32_0 = arith.constant 0 : i32
    return %arg0, %c0_i32 : i32, i32
  }
  func.func @transform_1(%arg0: i32) -> (i32, i32) {
    %c0_i32 = arith.constant 0 : i32
    %c0_i32_0 = arith.constant 0 : i32
    %c0_i32_1 = arith.constant 0 : i32
    return %c0_i32, %c0_i32_0 : i32, i32
  }
  func.func @transform_2(%arg0: i32) -> (i32, i32) {
    %c0_i32 = arith.constant 0 : i32
    %c0_i32_0 = arith.constant 0 : i32
    %c0_i32_1 = arith.constant 0 : i32
    return %c0_i32, %c0_i32_0 : i32, i32
  }
  func.func @transform_3(%arg0: i32) -> (i32, i32) {
    %c0_i32 = arith.constant 0 : i32
    %c0_i32_0 = arith.constant 0 : i32
    %c0_i32_1 = arith.constant 0 : i32
    return %c0_i32, %c0_i32_0 : i32, i32
  }
  func.func @transform_4(%arg0: i32) -> (i32, i32) {
    %c0_i32 = arith.constant 0 : i32
    %c0_i32_0 = arith.constant 0 : i32
    %c0_i32_1 = arith.constant 0 : i32
    return %c0_i32, %c0_i32_0 : i32, i32
  }
  func.func @transform_5(%arg0: i32) -> (i32, i32) {
    %c0_i32 = arith.constant 0 : i32
    %c0_i32_0 = arith.constant 0 : i32
    %c0_i32_1 = arith.constant 0 : i32
    return %c0_i32, %c0_i32_0 : i32, i32
  }
  func.func @transform_6(%arg0: i32) -> (i32, i32) {
    %c0_i32 = arith.constant 0 : i32
    %c0_i32_0 = arith.constant 0 : i32
    return %arg0, %c0_i32 : i32, i32
  }
}

module attributes {stable_mosaic.version = 11 : i64} {
  func.func @_linear_res_kernel(%arg0: i32, %arg1: memref<16x64xf32, #tpu.memory_space<vmem>>, %arg2: memref<64x256xbf16, #tpu.memory_space<vmem>>, %arg3: memref<128x128xbf16, #tpu.memory_space<vmem>>, %arg4: memref<8x128xf32, #tpu.memory_space<vmem>>, %arg5: memref<128x32xf32, #tpu.memory_space<vmem>>, %arg6: memref<32x128xf32, #tpu.memory_space<vmem>>, %arg7: memref<16x128xf32, #tpu.memory_space<vmem>>) attributes {dimension_semantics = [#tpu.dimension_semantics<parallel>], iteration_bounds = array<i64: 1>, scalar_prefetch = 0 : i64, scratch_operands = 0 : i64, tpu.core_type = #tpu.core_type<tc>, window_params = [{transform_indices = @transform_0, window_bounds = array<i64: 16, 64>}, {pipeline_mode = #tpu.pipeline_mode<synchronous>, transform_indices = @transform_1, window_bounds = array<i64: 64, 256>}, {pipeline_mode = #tpu.pipeline_mode<synchronous>, transform_indices = @transform_2, window_bounds = array<i64: 128, 128>}, {pipeline_mode = #tpu.pipeline_mode<synchronous>, transform_indices = @transform_3, window_bounds = array<i64: 8, 128>}, {pipeline_mode = #tpu.pipeline_mode<synchronous>, transform_indices = @transform_4, window_bounds = array<i64: 128, 32>}, {pipeline_mode = #tpu.pipeline_mode<synchronous>, transform_indices = @transform_5, window_bounds = array<i64: 32, 128>}, {transform_indices = @transform_6, window_bounds = array<i64: 16, 128>}]} {
    %c0 = arith.constant 0 : index
    %c0_0 = arith.constant 0 : index
    %0 = vector.load %arg5[%c0, %c0_0] : memref<128x32xf32, #tpu.memory_space<vmem>>, vector<128x32xf32>
    %c0_1 = arith.constant 0 : index
    %c0_2 = arith.constant 0 : index
    %1 = vector.load %arg6[%c0_1, %c0_2] : memref<32x128xf32, #tpu.memory_space<vmem>>, vector<32x128xf32>
    %c0_3 = arith.constant 0 : index
    %c0_4 = arith.constant 0 : index
    %2 = vector.load %arg4[%c0_3, %c0_4] : memref<8x128xf32, #tpu.memory_space<vmem>>, vector<8x128xf32>
    %3 = vector.extract_strided_slice %2 {offsets = [0, 0], sizes = [1, 128], strides = [1, 1]} : vector<8x128xf32> to vector<1x128xf32>
    %4 = vector.extract_strided_slice %2 {offsets = [1, 0], sizes = [1, 128], strides = [1, 1]} : vector<8x128xf32> to vector<1x128xf32>
    %5 = vector.extract_strided_slice %2 {offsets = [2, 0], sizes = [1, 128], strides = [1, 1]} : vector<8x128xf32> to vector<1x128xf32>
    %6 = vector.extract_strided_slice %2 {offsets = [3, 0], sizes = [1, 128], strides = [1, 1]} : vector<8x128xf32> to vector<1x128xf32>
    %c0_5 = arith.constant 0 : index
    %c0_6 = arith.constant 0 : index
    %7 = vector.load %arg1[%c0_5, %c0_6] : memref<16x64xf32, #tpu.memory_space<vmem>>, vector<16x64xf32>
    %8 = arith.truncf %7 : vector<16x64xf32> to vector<16x64xbf16>
    %c0_7 = arith.constant 0 : index
    %c0_8 = arith.constant 0 : index
    %9 = vector.load %arg2[%c0_7, %c0_8] : memref<64x256xbf16, #tpu.memory_space<vmem>>, vector<64x256xbf16>
    %cst = arith.constant dense<0.000000e+00> : vector<16x256xf32>
    %10 = tpu.matmul %8, %9, %cst {dimension_numbers = #tpu.dot_dimension_numbers<[1], [0], [0], [1], [0, 0, 1, 1], [], []>} : vector<16x64xbf16>, vector<64x256xbf16>, vector<16x256xf32> -> vector<16x256xf32>
    %11 = vector.extract_strided_slice %10 {offsets = [0, 0], sizes = [16, 128], strides = [1, 1]} : vector<16x256xf32> to vector<16x128xf32>
    %cst_9 = arith.constant dense<0.000000e+00> : vector<16x32xf32>
    %12 = tpu.matmul %11, %0, %cst_9 {dimension_numbers = #tpu.dot_dimension_numbers<[1], [0], [0], [1], [0, 0, 1, 1], [], []>} : vector<16x128xf32>, vector<128x32xf32>, vector<16x32xf32> -> vector<16x32xf32>
    %cst_10 = arith.constant 2.500000e-01 : f32
    %13 = vector.broadcast %cst_10 : f32 to vector<16x32xf32>
    %14 = arith.mulf %12, %13 : vector<16x32xf32>
    %15 = arith.mulf %11, %11 : vector<16x128xf32>
    %cst_11 = arith.constant dense<0.000000e+00> : vector<16x32xf32>
    %16 = tpu.matmul %15, %0, %cst_11 {dimension_numbers = #tpu.dot_dimension_numbers<[1], [0], [0], [1], [0, 0, 1, 1], [], []>} : vector<16x128xf32>, vector<128x32xf32>, vector<16x32xf32> -> vector<16x32xf32>
    %cst_12 = arith.constant 2.500000e-01 : f32
    %17 = vector.broadcast %cst_12 : f32 to vector<16x32xf32>
    %18 = arith.mulf %16, %17 : vector<16x32xf32>
    %19 = arith.mulf %14, %14 : vector<16x32xf32>
    %20 = arith.subf %18, %19 : vector<16x32xf32>
    %cst_13 = arith.constant 0.000000e+00 : f32
    %21 = vector.broadcast %cst_13 : f32 to vector<16x32xf32>
    %22 = arith.maximumf %20, %21 : vector<16x32xf32>
    %cst_14 = arith.constant 9.99999974E-6 : f32
    %23 = vector.broadcast %cst_14 : f32 to vector<16x32xf32>
    %24 = arith.addf %22, %23 : vector<16x32xf32>
    %25 = math.rsqrt %24 : vector<16x32xf32>
    %cst_15 = arith.constant 0.000000e+00 : f32
    %26 = vector.broadcast %cst_15 : f32 to vector<16x32xf32>
    %27 = arith.subf %26, %14 : vector<16x32xf32>
    %28 = arith.mulf %27, %25 : vector<16x32xf32>
    %29 = tpu.concatenate %25, %28 in 0 : vector<16x32xf32>, vector<16x32xf32> -> vector<32x32xf32>
    %cst_16 = arith.constant dense<0.000000e+00> : vector<32x128xf32>
    %30 = tpu.matmul %29, %1, %cst_16 {dimension_numbers = #tpu.dot_dimension_numbers<[1], [0], [0], [1], [0, 0, 1, 1], [], []>} : vector<32x32xf32>, vector<32x128xf32>, vector<32x128xf32> -> vector<32x128xf32>
    %31 = vector.extract_strided_slice %30 {offsets = [0, 0], sizes = [16, 128], strides = [1, 1]} : vector<32x128xf32> to vector<16x128xf32>
    %32 = vector.broadcast %3 : vector<1x128xf32> to vector<16x128xf32>
    %33 = arith.mulf %31, %32 : vector<16x128xf32>
    %34 = vector.extract_strided_slice %30 {offsets = [16, 0], sizes = [16, 128], strides = [1, 1]} : vector<32x128xf32> to vector<16x128xf32>
    %35 = vector.broadcast %3 : vector<1x128xf32> to vector<16x128xf32>
    %36 = arith.mulf %34, %35 : vector<16x128xf32>
    %37 = vector.broadcast %4 : vector<1x128xf32> to vector<16x128xf32>
    %38 = arith.addf %36, %37 : vector<16x128xf32>
    %39 = arith.mulf %11, %33 : vector<16x128xf32>
    %40 = arith.addf %39, %38 : vector<16x128xf32>
    %cst_17 = arith.constant 0.000000e+00 : f32
    %41 = vector.broadcast %cst_17 : f32 to vector<16x128xf32>
    %42 = arith.maximumf %40, %41 : vector<16x128xf32>
    %43 = arith.truncf %42 : vector<16x128xf32> to vector<16x128xbf16>
    %c0_18 = arith.constant 0 : index
    %c0_19 = arith.constant 0 : index
    %44 = vector.load %arg3[%c0_18, %c0_19] : memref<128x128xbf16, #tpu.memory_space<vmem>>, vector<128x128xbf16>
    %cst_20 = arith.constant dense<0.000000e+00> : vector<16x128xf32>
    %45 = tpu.matmul %43, %44, %cst_20 {dimension_numbers = #tpu.dot_dimension_numbers<[1], [0], [0], [1], [0, 0, 1, 1], [], []>} : vector<16x128xbf16>, vector<128x128xbf16>, vector<16x128xf32> -> vector<16x128xf32>
    %cst_21 = arith.constant dense<0.000000e+00> : vector<16x32xf32>
    %46 = tpu.matmul %45, %0, %cst_21 {dimension_numbers = #tpu.dot_dimension_numbers<[1], [0], [0], [1], [0, 0, 1, 1], [], []>} : vector<16x128xf32>, vector<128x32xf32>, vector<16x32xf32> -> vector<16x32xf32>
    %cst_22 = arith.constant 2.500000e-01 : f32
    %47 = vector.broadcast %cst_22 : f32 to vector<16x32xf32>
    %48 = arith.mulf %46, %47 : vector<16x32xf32>
    %49 = arith.mulf %45, %45 : vector<16x128xf32>
    %cst_23 = arith.constant dense<0.000000e+00> : vector<16x32xf32>
    %50 = tpu.matmul %49, %0, %cst_23 {dimension_numbers = #tpu.dot_dimension_numbers<[1], [0], [0], [1], [0, 0, 1, 1], [], []>} : vector<16x128xf32>, vector<128x32xf32>, vector<16x32xf32> -> vector<16x32xf32>
    %cst_24 = arith.constant 2.500000e-01 : f32
    %51 = vector.broadcast %cst_24 : f32 to vector<16x32xf32>
    %52 = arith.mulf %50, %51 : vector<16x32xf32>
    %53 = arith.mulf %48, %48 : vector<16x32xf32>
    %54 = arith.subf %52, %53 : vector<16x32xf32>
    %cst_25 = arith.constant 0.000000e+00 : f32
    %55 = vector.broadcast %cst_25 : f32 to vector<16x32xf32>
    %56 = arith.maximumf %54, %55 : vector<16x32xf32>
    %cst_26 = arith.constant 9.99999974E-6 : f32
    %57 = vector.broadcast %cst_26 : f32 to vector<16x32xf32>
    %58 = arith.addf %56, %57 : vector<16x32xf32>
    %59 = math.rsqrt %58 : vector<16x32xf32>
    %cst_27 = arith.constant 0.000000e+00 : f32
    %60 = vector.broadcast %cst_27 : f32 to vector<16x32xf32>
    %61 = arith.subf %60, %48 : vector<16x32xf32>
    %62 = arith.mulf %61, %59 : vector<16x32xf32>
    %63 = tpu.concatenate %59, %62 in 0 : vector<16x32xf32>, vector<16x32xf32> -> vector<32x32xf32>
    %cst_28 = arith.constant dense<0.000000e+00> : vector<32x128xf32>
    %64 = tpu.matmul %63, %1, %cst_28 {dimension_numbers = #tpu.dot_dimension_numbers<[1], [0], [0], [1], [0, 0, 1, 1], [], []>} : vector<32x32xf32>, vector<32x128xf32>, vector<32x128xf32> -> vector<32x128xf32>
    %65 = vector.extract_strided_slice %64 {offsets = [0, 0], sizes = [16, 128], strides = [1, 1]} : vector<32x128xf32> to vector<16x128xf32>
    %66 = vector.broadcast %5 : vector<1x128xf32> to vector<16x128xf32>
    %67 = arith.mulf %65, %66 : vector<16x128xf32>
    %68 = vector.extract_strided_slice %64 {offsets = [16, 0], sizes = [16, 128], strides = [1, 1]} : vector<32x128xf32> to vector<16x128xf32>
    %69 = vector.broadcast %5 : vector<1x128xf32> to vector<16x128xf32>
    %70 = arith.mulf %68, %69 : vector<16x128xf32>
    %71 = vector.broadcast %6 : vector<1x128xf32> to vector<16x128xf32>
    %72 = arith.addf %70, %71 : vector<16x128xf32>
    %73 = arith.mulf %45, %67 : vector<16x128xf32>
    %74 = arith.addf %73, %72 : vector<16x128xf32>
    %75 = vector.extract_strided_slice %10 {offsets = [0, 128], sizes = [16, 128], strides = [1, 1]} : vector<16x256xf32> to vector<16x128xf32>
    %76 = vector.extract_strided_slice %2 {offsets = [4, 0], sizes = [1, 128], strides = [1, 1]} : vector<8x128xf32> to vector<1x128xf32>
    %77 = vector.extract_strided_slice %2 {offsets = [5, 0], sizes = [1, 128], strides = [1, 1]} : vector<8x128xf32> to vector<1x128xf32>
    %cst_29 = arith.constant dense<0.000000e+00> : vector<16x32xf32>
    %78 = tpu.matmul %75, %0, %cst_29 {dimension_numbers = #tpu.dot_dimension_numbers<[1], [0], [0], [1], [0, 0, 1, 1], [], []>} : vector<16x128xf32>, vector<128x32xf32>, vector<16x32xf32> -> vector<16x32xf32>
    %cst_30 = arith.constant 2.500000e-01 : f32
    %79 = vector.broadcast %cst_30 : f32 to vector<16x32xf32>
    %80 = arith.mulf %78, %79 : vector<16x32xf32>
    %81 = arith.mulf %75, %75 : vector<16x128xf32>
    %cst_31 = arith.constant dense<0.000000e+00> : vector<16x32xf32>
    %82 = tpu.matmul %81, %0, %cst_31 {dimension_numbers = #tpu.dot_dimension_numbers<[1], [0], [0], [1], [0, 0, 1, 1], [], []>} : vector<16x128xf32>, vector<128x32xf32>, vector<16x32xf32> -> vector<16x32xf32>
    %cst_32 = arith.constant 2.500000e-01 : f32
    %83 = vector.broadcast %cst_32 : f32 to vector<16x32xf32>
    %84 = arith.mulf %82, %83 : vector<16x32xf32>
    %85 = arith.mulf %80, %80 : vector<16x32xf32>
    %86 = arith.subf %84, %85 : vector<16x32xf32>
    %cst_33 = arith.constant 0.000000e+00 : f32
    %87 = vector.broadcast %cst_33 : f32 to vector<16x32xf32>
    %88 = arith.maximumf %86, %87 : vector<16x32xf32>
    %cst_34 = arith.constant 9.99999974E-6 : f32
    %89 = vector.broadcast %cst_34 : f32 to vector<16x32xf32>
    %90 = arith.addf %88, %89 : vector<16x32xf32>
    %91 = math.rsqrt %90 : vector<16x32xf32>
    %cst_35 = arith.constant 0.000000e+00 : f32
    %92 = vector.broadcast %cst_35 : f32 to vector<16x32xf32>
    %93 = arith.subf %92, %80 : vector<16x32xf32>
    %94 = arith.mulf %93, %91 : vector<16x32xf32>
    %95 = tpu.concatenate %91, %94 in 0 : vector<16x32xf32>, vector<16x32xf32> -> vector<32x32xf32>
    %cst_36 = arith.constant dense<0.000000e+00> : vector<32x128xf32>
    %96 = tpu.matmul %95, %1, %cst_36 {dimension_numbers = #tpu.dot_dimension_numbers<[1], [0], [0], [1], [0, 0, 1, 1], [], []>} : vector<32x32xf32>, vector<32x128xf32>, vector<32x128xf32> -> vector<32x128xf32>
    %97 = vector.extract_strided_slice %96 {offsets = [0, 0], sizes = [16, 128], strides = [1, 1]} : vector<32x128xf32> to vector<16x128xf32>
    %98 = vector.broadcast %76 : vector<1x128xf32> to vector<16x128xf32>
    %99 = arith.mulf %97, %98 : vector<16x128xf32>
    %100 = vector.extract_strided_slice %96 {offsets = [16, 0], sizes = [16, 128], strides = [1, 1]} : vector<32x128xf32> to vector<16x128xf32>
    %101 = vector.broadcast %76 : vector<1x128xf32> to vector<16x128xf32>
    %102 = arith.mulf %100, %101 : vector<16x128xf32>
    %103 = vector.broadcast %77 : vector<1x128xf32> to vector<16x128xf32>
    %104 = arith.addf %102, %103 : vector<16x128xf32>
    %105 = arith.mulf %75, %99 : vector<16x128xf32>
    %106 = arith.addf %105, %104 : vector<16x128xf32>
    %107 = arith.addf %74, %106 : vector<16x128xf32>
    %cst_37 = arith.constant 0.000000e+00 : f32
    %108 = vector.broadcast %cst_37 : f32 to vector<16x128xf32>
    %109 = arith.maximumf %107, %108 : vector<16x128xf32>
    %c0_38 = arith.constant 0 : index
    %c0_39 = arith.constant 0 : index
    %110 = vector.load %arg7[%c0_38, %c0_39] : memref<16x128xf32, #tpu.memory_space<vmem>>, vector<16x128xf32>
    tpu.vector_store %arg7[%c0_38, %c0_39], %109 {strides = array<i32>} : memref<16x128xf32, #tpu.memory_space<vmem>>, vector<16x128xf32>,
    return
  }
  func.func @transform_0(%arg0: i32) -> (i32, i32) {
    %c0_i32 = arith.constant 0 : i32
    %c0_i32_0 = arith.constant 0 : i32
    return %arg0, %c0_i32 : i32, i32
  }
  func.func @transform_1(%arg0: i32) -> (i32, i32) {
    %c0_i32 = arith.constant 0 : i32
    %c0_i32_0 = arith.constant 0 : i32
    %c0_i32_1 = arith.constant 0 : i32
    return %c0_i32, %c0_i32_0 : i32, i32
  }
  func.func @transform_2(%arg0: i32) -> (i32, i32) {
    %c0_i32 = arith.constant 0 : i32
    %c0_i32_0 = arith.constant 0 : i32
    %c0_i32_1 = arith.constant 0 : i32
    return %c0_i32, %c0_i32_0 : i32, i32
  }
  func.func @transform_3(%arg0: i32) -> (i32, i32) {
    %c0_i32 = arith.constant 0 : i32
    %c0_i32_0 = arith.constant 0 : i32
    %c0_i32_1 = arith.constant 0 : i32
    return %c0_i32, %c0_i32_0 : i32, i32
  }
  func.func @transform_4(%arg0: i32) -> (i32, i32) {
    %c0_i32 = arith.constant 0 : i32
    %c0_i32_0 = arith.constant 0 : i32
    %c0_i32_1 = arith.constant 0 : i32
    return %c0_i32, %c0_i32_0 : i32, i32
  }
  func.func @transform_5(%arg0: i32) -> (i32, i32) {
    %c0_i32 = arith.constant 0 : i32
    %c0_i32_0 = arith.constant 0 : i32
    %c0_i32_1 = arith.constant 0 : i32
    return %c0_i32, %c0_i32_0 : i32, i32
  }
  func.func @transform_6(%arg0: i32) -> (i32, i32) {
    %c0_i32 = arith.constant 0 : i32
    %c0_i32_0 = arith.constant 0 : i32
    return %arg0, %c0_i32 : i32, i32
  }
}

</mosaic_0001>

<bundles_post_ra>
// kernel: tpu_custom_call.1
= control target key start
LH: loop header
LB: loop body
LE: loop exit
PB: predicated region body
PF: predicated region fallthrough
CT: control target
= control target key end

     0   :  { %11 = vsyncpa [#allocation3], 0  ;;  %s2193_s0 = inlined_call_operand.hbm [shape: f32[16,64], index: 0, kind: input, shape index: {}]   ;;  %s2194_s1 = inlined_call_operand.vmem [shape: bf16[64,256], index: 1, kind: input, shape index: {}]   ;;  %s2195_s2 = inlined_call_operand.vmem [shape: bf16[128,128], index: 2, kind: input, shape index: {}]   ;;  %s2196_s3 = inlined_call_operand.hbm [shape: f32[8,128], index: 3, kind: input, shape index: {}]   ;;  %s2197_s4 = inlined_call_operand.vmem [shape: f32[128,32], index: 4, kind: input, shape index: {}]   ;;  %s2198_s5 = inlined_call_operand.vmem [shape: f32[32,128], index: 5, kind: input, shape index: {}]   ;;  %s2199_s6 = inlined_call_operand.hbm [shape: f32[16,128], index: 6, kind: output, shape index: {}]  }
   0x1   :  { %12 = vsyncpa [#allocation6], 0 }
   0x2   :  { %13 = vsyncpa [#allocation4], 0  ;;  %s1706_s21 = smov [#allocation2]  }
   0x3   :  { %s19_s22 = sshll.u32 %s1706_s21, 4  ;;  %s20_s22 = int_to_ptr.vmem [resolvable:$true] %s19_s22 }
   0x4   :  { %s1648_s23 = scalar_lea.vmem %s20_s22, 256  ;;  %p1653_p1 = scmp.lt.s32.totalorder %s20_s22, %s20_s22 }
   0x5   :  { %p1649_p0 = scmp.ne.s32.totalorder %s20_s22, %s1648_s23  ;;  %p1654_p2 = scmp.lt.s32.totalorder %s1648_s23, %s1648_s23 }
   0x7   :  { %p1655_p3 = por %p1654_p2, %p1653_p1 }
   0x9   :  { %p1656_p4 = pnand %p1655_p3, %p1649_p0 }
   0xb   :  { %1659 = shalt.err (!%p1656_p4)
}
   0xc   :  { %s1707_s24 = smov 128   ;;  %s1708_s25 = smov 8  }
   0xd   :  { %25 = dma.hbm_to_vmem [thread:$0]  %s2193_s0, 256, %s20_s22, [#allocation3], %s1707_s24, %s1707_s24, %s1708_s25  }
   0xe   :  { %s1709_s28 = smov [#allocation5]  }
   0xf   :  { %s36_s29 = sshll.u32 %s1709_s28, 4  ;;  %s37_s29 = int_to_ptr.vmem [resolvable:$true] %s36_s29 }
  0x10   :  { %s1668_s30 = scalar_lea.vmem %s37_s29, 128  ;;  %p1673_p6 = scmp.lt.s32.totalorder %s37_s29, %s37_s29 }
  0x11   :  { %p1669_p5 = scmp.ne.s32.totalorder %s37_s29, %s1668_s30  ;;  %p1674_p7 = scmp.lt.s32.totalorder %s1668_s30, %s1668_s30 }
  0x13   :  { %p1675_p8 = por %p1674_p7, %p1673_p6 }
  0x15   :  { %p1676_p9 = pnand %p1675_p8, %p1669_p5 }
  0x17   :  { %1679 = shalt.err (!%p1676_p9)
}
  0x18   :  { %39 = dma.hbm_to_vmem [thread:$0]  %s2196_s3, 128, %s37_s29, [#allocation6]  }
  0x19   :  { %1700 = dma.done.wait [#allocation3], 256  }
  0x1a   :  { %1701 = vsyncadd [#allocation3], 4294967040 }
  0x1b   :  { %1702 = dma.done.wait [#allocation6], 128  }
  0x1c   :  { %1703 = vsyncadd [#allocation6], 4294967168  ;;  %v1710_v0 = vmov 0   ;;  %v1608_v1 = vld [vmem:[%s2194_s1 + $0x34] ss:$8 sps:$4 sm:$0xff]   ;;  %v1794_v10 = vld [vmem:[%s2197_s4 + $0x68] sm:$0xff] }
  0x1d   :  { %159 = vmatprep.mubr.bf16.mxu0 %v1710_v0  ;;  %v1610_v2 = vld [vmem:[%s2194_s1 + $0x30] ss:$8 sps:$4 sm:$0xff]   ;;  %135 = vmatprep.subr.bf16.mxu0 %v1608_v1  ;;  %v1611_v3 = vld [vmem:[%s2194_s1 + $0x24] ss:$8 sps:$4 sm:$0xff]   ;;  %v1613_v4 = vld [vmem:[%s2194_s1 + $0x20] ss:$8 sps:$4 sm:$0xff]  }
  0x1e   :  { %136 = vmatpush1.bf16.msra.mxu0 %v1610_v2  ;;  %v1614_v5 = vld [vmem:[%s2194_s1 + $0x14] ss:$8 sps:$4 sm:$0xff]   ;;  %v1616_v8 = vld [vmem:[%s2194_s1 + $0x10] ss:$8 sps:$4 sm:$0xff]   ;;  %v1617_v9 = vld [vmem:[%s2194_s1 + $0x4] ss:$8 sps:$4 sm:$0xff]  }
  0x1f   :  { %137 = vmatprep.subr.bf16.mxu0 %v1611_v3  ;;  %v1776_v6 = vld [vmem:[%s2197_s4 + $0x78] sm:$0xff]  ;;  %v1781_v7 = vld [vmem:[%s2197_s4 + $0x70] sm:$0xff]  ;;  %v1619_v11 = vld [vmem:[%s2194_s1] ss:$8 sps:$4 sm:$0xff]   ;;  %vm123_vm0 = vcmask 523264   ;;  %v1711_v37 = vmov 0.0  }
  0x20   :  { %1328 = vmatprep.subr.mxu1 %v1776_v6  ;;  %v72_v12 = vld [vmem:[#allocation2] sm:$0xff]  ;;  %v73_v13 = vld [vmem:[#allocation2 + $0x8] sm:$0xff]  ;;  %v1809_v15 = vld [vmem:[%s2197_s4 + $0x58] sm:$0xff]  ;;  %vm340_vm1 = vcmask 261120   ;;  %vm1712_vm2 = vmmov 0  }
  0x21   :  { %1329 = vmatpush3.msra.mxu1 %v1776_v6  ;;  %v1804_v14 = vld [vmem:[%s2197_s4 + $0x60] sm:$0xff]  ;;  %v1816_v16 = vld [vmem:[%s2197_s4 + $0x50] sm:$0xff]  ;;  %v74_v17 = vpack.c.bf16 %v73_v13, %v72_v12  ;;  %v1826_v18 = vld [vmem:[%s2197_s4 + $0x48] sm:$0xff] }
  0x22   :  { %138 = vmatpush1.bf16.msra.mxu0 %v1613_v4  ;;  %1330 = vmatprep.subr.mxu1 %v1781_v7  ;;  %v1834_v19 = vld [vmem:[%s2197_s4 + $0x40] sm:$0xff]  ;;  %v1843_v20 = vld [vmem:[%s2197_s4 + $0x38] sm:$0xff]  ;;  %v1852_v21 = vld [vmem:[%s2197_s4 + $0x30] sm:$0xff] }
  0x23   :  { %139 = vmatprep.subr.bf16.mxu0 %v1614_v5  ;;  %1331 = vmatpush3.msra.mxu1 %v1781_v7  ;;  %v1861_v22 = vld [vmem:[%s2197_s4 + $0x28] sm:$0xff]  ;;  %v1870_v23 = vld [vmem:[%s2197_s4 + $0x20] sm:$0xff]  ;;  %v1879_v24 = vld [vmem:[%s2197_s4 + $0x18] sm:$0xff]  ;;  %v438_v5 = vlaneseq }
  0x24   :  { %1332 = vmatprep.subr.mxu1 %v1794_v10  ;;  %v1888_v25 = vld [vmem:[%s2197_s4 + $0x10] sm:$0xff]  ;;  %v1912_v26 = vld [vmem:[%s2197_s4 + $0x8] sm:$0xff]  ;;  %v1920_v27 = vld [vmem:[%s2197_s4] sm:$0xff] }
  0x25   :  { %1333 = vmatpush3.msra.mxu1 %v1794_v10  ;;  %v1974_v33 = vld [vmem:[%s2198_s5 + $0x18] sm:$0xff]  ;;  %v1979_v34 = vld [vmem:[%s2198_s5 + $0x10] sm:$0xff]  ;;  %v1987_v35 = vld [vmem:[%s2198_s5 + $0x8] sm:$0xff] }
  0x26   :  { %140 = vmatpush1.bf16.msra.mxu0 %v1616_v8  ;;  %1334 = vmatprep.subr.mxu1 %v1804_v14  ;;  %v1994_v36 = vld [vmem:[%s2198_s5] sm:$0xff]  ;;  %v1620_v56 = vld [vmem:[%s2195_s2 + $0x38] sm:$0xff]   ;;  %v1621_v61 = vld [vmem:[%s2195_s2 + $0x30] sm:$0xff]   ;;  %v2031_v8 = vshrl.u32 %v438_v5, 7 }
  0x27   :  { %141 = vmatprep.subr.bf16.mxu0 %v1617_v9  ;;  %1335 = vmatpush3.msra.mxu1 %v1804_v14  ;;  %v1622_v63 = vld [vmem:[%s2195_s2 + $0x28] sm:$0xff]   ;;  %v1623_v0 = vld [vmem:[%s2195_s2 + $0x20] sm:$0xff]   ;;  %v1624_v1 = vld [vmem:[%s2195_s2 + $0x18] sm:$0xff]  }
  0x28   :  { %1336 = vmatprep.subr.mxu1 %v1809_v15  ;;  %v1625_v2 = vld [vmem:[%s2195_s2 + $0x10] sm:$0xff]   ;;  %v1626_v3 = vld [vmem:[%s2195_s2 + $0x8] sm:$0xff]   ;;  %v1627_v4 = vld [vmem:[%s2195_s2] sm:$0xff]   ;;  %v440_v9 = vsub.s32 0, %v2031_v8  ;;  %v448_v13 = vsub.s32 1, %v2031_v8  ;;  %s1713_s2 = smov [#allocation7]  }
  0x29   :  { %1337 = vmatpush3.msra.mxu1 %v1809_v15  ;;  %s1145_s29 = sshll.u32 %s1713_s2, 4  ;;  %s1146_s29 = int_to_ptr.vmem [resolvable:$true] %s1145_s29 }
  0x2a   :  { %142 = vmatpush1.bf16.msra.mxu0 %v1619_v11  ;;  %1338 = vmatprep.subr.mxu1 %v1816_v16  ;;  %v2034_v11 = vld [vmem:[#allocation5] sm:$0xff]  ;;  %s1680_s30 = scalar_lea.vmem %s1146_s29, 256  ;;  %p1685_p11 = scmp.lt.s32.totalorder %s1146_s29, %s1146_s29 }
  0x2b   :  { %1363 = vmatprep.subr.mxu0 %v1776_v6  ;;  %1339 = vmatpush3.msra.mxu1 %v1816_v16  ;;  %v441_v12 = vrot.slane %v2034_v11, %v440_v9  ;;  %p1681_p10 = scmp.ne.s32.totalorder %s1146_s29, %s1680_s30  ;;  %p1686_p12 = scmp.lt.s32.totalorder %s1680_s30, %s1680_s30 }
  0x2c   :  { %1340 = vmatprep.subr.mxu1 %v1826_v18 }
  0x2d   :  { %1166 = vmatmul.mubr.msk.bf16.vlgmr.msra.gmra.mxu0 %vm123_vm0, %v74_v17  ;;  %1341 = vmatpush3.msra.mxu1 %v1826_v18  ;;  %p1687_p13 = por %p1686_p12, %p1685_p11 }
  0x2e   :  { %1364 = vmatpush3.msra.mxu0 %v1776_v6  ;;  %1342 = vmatprep.subr.mxu1 %v1834_v19 }
  0x2f   :  { %1365 = vmatprep.subr.mxu0 %v1781_v7  ;;  %1343 = vmatpush3.msra.mxu1 %v1834_v19  ;;  %p1688_p0 = pnand %p1687_p13, %p1681_p10 }
  0x30   :  { %1366 = vmatpush3.msra.mxu0 %v1781_v7  ;;  %1344 = vmatprep.subr.mxu1 %v1843_v20 }
  0x31   :  { %1367 = vmatprep.subr.mxu0 %v1794_v10  ;;  %1345 = vmatpush3.msra.mxu1 %v1843_v20 }
  0x32   :  { %1368 = vmatpush3.msra.mxu0 %v1794_v10  ;;  %1346 = vmatprep.subr.mxu1 %v1852_v21 }
  0x33   :  { %1369 = vmatprep.subr.mxu0 %v1804_v14  ;;  %1347 = vmatpush3.msra.mxu1 %v1852_v21 }
  0x34   :  { %1370 = vmatpush3.msra.mxu0 %v1804_v14  ;;  %1348 = vmatprep.subr.mxu1 %v1861_v22 }
  0x35   :  { %1371 = vmatprep.subr.mxu0 %v1809_v15  ;;  %1349 = vmatpush3.msra.mxu1 %v1861_v22 }
  0x36   :  { %1372 = vmatpush3.msra.mxu0 %v1809_v15  ;;  %1350 = vmatprep.subr.mxu1 %v1870_v23 }
  0x37   :  { %1373 = vmatprep.subr.mxu0 %v1816_v16  ;;  %1351 = vmatpush3.msra.mxu1 %v1870_v23 }
  0x38   :  { %1374 = vmatpush3.msra.mxu0 %v1816_v16  ;;  %1352 = vmatprep.subr.mxu1 %v1879_v24 }
  0x39   :  { %1375 = vmatprep.subr.mxu0 %v1826_v18  ;;  %1353 = vmatpush3.msra.mxu1 %v1879_v24 }
  0x3a   :  { %1376 = vmatpush3.msra.mxu0 %v1826_v18  ;;  %1354 = vmatprep.subr.mxu1 %v1888_v25 }
  0x3b   :  { %1377 = vmatprep.subr.mxu0 %v1834_v19  ;;  %1355 = vmatpush3.msra.mxu1 %v1888_v25 }
  0x3c   :  { %1378 = vmatpush3.msra.mxu0 %v1834_v19  ;;  %1356 = vmatprep.subr.mxu1 %v1912_v26 }
  0x3d   :  { %1379 = vmatprep.subr.mxu0 %v1843_v20  ;;  %1357 = vmatpush3.msra.mxu1 %v1912_v26 }
  0x3e   :  { %1380 = vmatpush3.msra.mxu0 %v1843_v20  ;;  %1358 = vmatprep.subr.mxu1 %v1920_v27 }
  0x3f   :  { %1381 = vmatprep.subr.mxu0 %v1852_v21  ;;  %1359 = vmatpush3.msra.mxu1 %v1920_v27 }
  0x40   :  { %1382 = vmatpush3.msra.mxu0 %v1852_v21  ;;  %1398 = vmatprep.subr.mxu1 %v1974_v33 }
  0x41   :  { %1383 = vmatprep.subr.mxu0 %v1861_v22 }
  0x42   :  { %1384 = vmatpush3.msra.mxu0 %v1861_v22 }
  0x43   :  { %1385 = vmatprep.subr.mxu0 %v1870_v23 }
  0x44   :  { %1386 = vmatpush3.msra.mxu0 %v1870_v23 }
  0x45   :  { %1387 = vmatprep.subr.mxu0 %v1879_v24 }
  0x46   :  { %1388 = vmatpush3.msra.mxu0 %v1879_v24 }
  0x47   :  { %1389 = vmatprep.subr.mxu0 %v1888_v25 }
  0x48   :  { %1390 = vmatpush3.msra.mxu0 %v1888_v25 }
  0x49   :  { %1391 = vmatprep.subr.mxu0 %v1912_v26 }
  0x4a   :  { %1392 = vmatpush3.msra.mxu0 %v1912_v26 }
  0x4b   :  { %1393 = vmatprep.subr.mxu0 %v1920_v27 }
  0x4c   :  { %1394 = vmatpush3.msra.mxu0 %v1920_v27 }
  0x4d   :  { %1432 = vmatprep.subr.mxu0 %v1776_v6 }
  0xed   :  { %v1928_v28 = vpop.f32.mrf.mxu0 }
  0xee   :  { %v247_v29 = vmul.f32 %v1928_v28, %v1928_v28  ;;  %1360 = vmatprep.mubr.f32.mxu1 %v1928_v28 }
  0xef   :  { %v1933_v30 = vpop.f32.mrf.mxu0 }
  0xf0   :  { %1395 = vmatprep.mubr.f32.mxu0 %v247_v29 }
  0xf1   :  { %v1935_v31 = vpop.f32.mrf.mxu0 }
  0xf2   :  { %v248_v32 = vmul.f32 %v1935_v31, %v1935_v31  ;;  %1361 = vmatmul.mubr.f32.vlgmr.msra.gmra.mxu1 %v1935_v31 }
  0xf3   :  { %1399 = vmatpush3.msra.mxu1 %v1974_v33  ;;  %v2000_v38 = vpop.f32.mrf.mxu0 }
  0xf4   :  { %1396 = vmatmul.mubr.f32.vlgmr.msra.gmra.mxu0 %v248_v32  ;;  %1400 = vmatprep.subr.mxu1 %v1979_v34 }
  0xf5   :  { %1433 = vmatpush3.msra.mxu0 %v1776_v6  ;;  %1401 = vmatpush3.msra.mxu1 %v1979_v34 }
  0xf6   :  { %1434 = vmatprep.subr.mxu0 %v1781_v7  ;;  %1402 = vmatprep.subr.mxu1 %v1987_v35 }
  0xf7   :  { %1435 = vmatpush3.msra.mxu0 %v1781_v7  ;;  %1403 = vmatpush3.msra.mxu1 %v1987_v35 }
  0xf8   :  { %1436 = vmatprep.subr.mxu0 %v1794_v10  ;;  %1404 = vmatprep.subr.mxu1 %v1994_v36 }
  0xf9   :  { %1437 = vmatpush3.msra.mxu0 %v1794_v10  ;;  %1405 = vmatpush3.msra.mxu1 %v1994_v36 }
  0xfa   :  { %1438 = vmatprep.subr.mxu0 %v1804_v14  ;;  %1412 = vmatprep.subr.bf16.mxu1 %v1711_v37 }
  0xfb   :  { %1439 = vmatpush3.msra.mxu0 %v1804_v14 }
  0xfc   :  { %1440 = vmatprep.subr.mxu0 %v1809_v15 }
  0xfd   :  { %1441 = vmatpush3.msra.mxu0 %v1809_v15 }
  0xfe   :  { %1442 = vmatprep.subr.mxu0 %v1816_v16 }
  0xff   :  { %1443 = vmatpush3.msra.mxu0 %v1816_v16 }
 0x100   :  { %1444 = vmatprep.subr.mxu0 %v1826_v18 }
 0x101   :  { %1445 = vmatpush3.msra.mxu0 %v1826_v18 }
 0x102   :  { %1446 = vmatprep.subr.mxu0 %v1834_v19 }
 0x103   :  { %1447 = vmatpush3.msra.mxu0 %v1834_v19 }
 0x104   :  { %1448 = vmatprep.subr.mxu0 %v1843_v20 }
 0x105   :  { %1449 = vmatpush3.msra.mxu0 %v1843_v20 }
 0x106   :  { %1450 = vmatprep.subr.mxu0 %v1852_v21 }
 0x107   :  { %1451 = vmatpush3.msra.mxu0 %v1852_v21 }
 0x108   :  { %1452 = vmatprep.subr.mxu0 %v1861_v22 }
 0x109   :  { %1453 = vmatpush3.msra.mxu0 %v1861_v22 }
 0x10a   :  { %1454 = vmatprep.subr.mxu0 %v1870_v23 }
 0x10b   :  { %1455 = vmatpush3.msra.mxu0 %v1870_v23 }
 0x10c   :  { %1456 = vmatprep.subr.mxu0 %v1879_v24 }
 0x10d   :  { %1457 = vmatpush3.msra.mxu0 %v1879_v24 }
 0x10e   :  { %1458 = vmatprep.subr.mxu0 %v1888_v25 }
 0x10f   :  { %1459 = vmatpush3.msra.mxu0 %v1888_v25 }
 0x110   :  { %1460 = vmatprep.subr.mxu0 %v1912_v26 }
 0x111   :  { %1461 = vmatpush3.msra.mxu0 %v1912_v26 }
 0x112   :  { %1462 = vmatprep.subr.mxu0 %v1920_v27 }
 0x113   :  { %1463 = vmatpush3.msra.mxu0 %v1920_v27 }
 0x114   :  { %1502 = vmatprep.subr.mxu0 %v1974_v33 }
 0x1b2   :  { %v1362_v39 = vpop.f32.mrf.mxu1 }
 0x1b3   :  { %v246_v40 = vmul.f32 0.25, %v1362_v39  ;;  %v449_v39 = vrot.slane %v2034_v11, %v448_v13 }
 0x1b4   :  { %v236_v41 = vpop.f32.mrf.mxu1  ;;  %v1397_v42 = vpop.f32.mrf.mxu0 }
 0x1b5   :  { %v327_v43 = vmul.f32 %v246_v40, %v246_v40  ;;  %v245_v44 = vmul.f32 0.25, %v236_v41  ;;  %v325_v45 = vmul.f32 0.25, %v1397_v42  ;;  %v337_v60 = vsub.f32 0.0, %v246_v40 }
 0x1b6   :  { %v315_v46 = vpop.f32.mrf.mxu0 }
 0x1b7   :  { %v326_v47 = vmul.f32 %v245_v44, %v245_v44  ;;  %v329_v48 = vsub.f32 %v325_v45, %v327_v43  ;;  %v324_v49 = vmul.f32 0.25, %v315_v46  ;;  %v336_v55 = vsub.f32 0.0, %v245_v44 }
 0x1b9   :  { %v331_v50 = vmax.f32 %v329_v48, 0.0  ;;  %v328_v51 = vsub.f32 %v324_v49, %v326_v47 }
 0x1bb   :  { %v330_v52 = vmax.f32 %v328_v51, 0.0  ;;  %v333_v53 = vadd.f32 1e-05, %v331_v50 }
 0x1bd   :  { %v332_v54 = vadd.f32 1e-05, %v330_v52 }
 0x1bf   :  { %1628 = vrsqrt.f32 %v332_v54 }
 0x1c0   :  { %1630 = vrsqrt.f32 %v333_v53 }
 0x1cc   :  { %v1629_v57 = vpop.eup %1628 }
 0x1cd   :  { %v1631_v58 = vpop.eup %1630  ;;  %1406 = vmatprep.mubr.msk.f32.mxu1 %vm340_vm1, %v1629_v57  ;;  %v338_v59 = vmul.f32 %v1629_v57, %v336_v55 }
 0x1ce   :  { %1407 = vmatmul.mubr.msk.f32.vlgmr.msra.gmra.mxu1 %vm340_vm1, %v1631_v58  ;;  %v339_v62 = vmul.f32 %v1631_v58, %v337_v60  ;;  %v927_v58 = vmul.f32 %v2000_v38, %v2000_v38 }
 0x1cf   :  { %1409 = vmatprep.mubr.msk.f32.mxu1 %vm340_vm1, %v338_v59  ;;  %1413 = vmatpush3.bf16.msra.mxu1 %v1620_v56  ;;  %v926_v56 = vmul.f32 %v1933_v30, %v1933_v30 }
 0x1d0   :  { %1414 = vmatprep.subr.bf16.mxu1 %v1711_v37 }
 0x1d2   :  { %1410 = vmatmul.mubr.msk.f32.gmra.mxu1 %vm340_vm1, %v339_v62 }
 0x1d3   :  { %1415 = vmatpush3.bf16.msra.mxu1 %v1621_v61  ;;  %1428 = vmatprep.mubr.msk.bf16.mxu1 %vm1712_vm2, %v1711_v37 }
 0x1d4   :  { %1416 = vmatprep.subr.bf16.mxu1 %v1711_v37 }
 0x1d7   :  { %1417 = vmatpush3.bf16.msra.mxu1 %v1622_v63 }
 0x1d8   :  { %1418 = vmatprep.subr.bf16.mxu1 %v1711_v37 }
 0x1db   :  { %1419 = vmatpush3.bf16.msra.mxu1 %v1623_v0 }
 0x1dc   :  { %1420 = vmatprep.subr.bf16.mxu1 %v1711_v37 }
 0x1df   :  { %1421 = vmatpush3.bf16.msra.mxu1 %v1624_v1 }
 0x1e0   :  { %1422 = vmatprep.subr.bf16.mxu1 %v1711_v37 }
 0x1e3   :  { %1423 = vmatpush3.bf16.msra.mxu1 %v1625_v2 }
 0x1e4   :  { %1424 = vmatprep.subr.bf16.mxu1 %v1711_v37 }
 0x1e7   :  { %1425 = vmatpush3.bf16.msra.mxu1 %v1626_v3 }
 0x1e8   :  { %1426 = vmatprep.subr.bf16.mxu1 %v1711_v37 }
 0x1eb   :  { %1427 = vmatpush3.bf16.msra.mxu1 %v1627_v4 }
 0x1ec   :  { %1467 = vmatprep.subr.mxu1 %v1776_v6 }
 0x28e   :  { %v1408_v17 = vpop.f32.mrf.mxu1 }
 0x28f   :  { %v443_v32 = vmul.f32 %v1408_v17, %v441_v12 }
 0x290   :  { %v419_v29 = vpop.f32.mrf.mxu1 }
 0x291   :  { %v442_v41 = vmul.f32 %v441_v12, %v419_v29  ;;  %v453_v43 = vmul.f32 %v443_v32, %v1935_v31 }
 0x292   :  { %v1411_v40 = vpop.f32.mrf.mxu1 }
 0x293   :  { %v445_v42 = vmul.f32 %v1411_v40, %v441_v12  ;;  %v452_v46 = vmul.f32 %v442_v41, %v1928_v28 }
 0x294   :  { %v429_v37 = vpop.f32.mrf.mxu1 }
 0x295   :  { %v451_v44 = vadd.f32 %v449_v39, %v445_v42  ;;  %v444_v45 = vmul.f32 %v441_v12, %v429_v37 }
 0x297   :  { %v455_v47 = vadd.f32 %v453_v43, %v451_v44  ;;  %v450_v48 = vadd.f32 %v449_v39, %v444_v45 }
 0x299   :  { %v454_v49 = vadd.f32 %v452_v46, %v450_v48  ;;  %v457_v50 = vmax.f32 %v455_v47, 0.0 }
 0x29b   :  { %v456_v51 = vmax.f32 %v454_v49, 0.0 }
 0x29d   :  { %v458_v52 = vpack.c.bf16 %v457_v50, %v456_v51 }
 0x29f   :  { %1429 = vmatmul.mubr.bf16.vlgmr.msra.gmra.mxu1 %v458_v52 }
 0x2a0   :  { %1468 = vmatpush3.msra.mxu1 %v1776_v6 }
 0x2a1   :  { %1469 = vmatprep.subr.mxu1 %v1781_v7 }
 0x2a2   :  { %1470 = vmatpush3.msra.mxu1 %v1781_v7 }
 0x2a3   :  { %1471 = vmatprep.subr.mxu1 %v1794_v10 }
 0x2a4   :  { %1472 = vmatpush3.msra.mxu1 %v1794_v10 }
 0x2a5   :  { %1473 = vmatprep.subr.mxu1 %v1804_v14 }
 0x2a6   :  { %1474 = vmatpush3.msra.mxu1 %v1804_v14 }
 0x2a7   :  { %1475 = vmatprep.subr.mxu1 %v1809_v15 }
 0x2a8   :  { %1476 = vmatpush3.msra.mxu1 %v1809_v15 }
 0x2a9   :  { %1477 = vmatprep.subr.mxu1 %v1816_v16 }
 0x2aa   :  { %1478 = vmatpush3.msra.mxu1 %v1816_v16 }
 0x2ab   :  { %1479 = vmatprep.subr.mxu1 %v1826_v18 }
 0x2ac   :  { %1480 = vmatpush3.msra.mxu1 %v1826_v18 }
 0x2ad   :  { %1481 = vmatprep.subr.mxu1 %v1834_v19 }
 0x2ae   :  { %1482 = vmatpush3.msra.mxu1 %v1834_v19 }
 0x2af   :  { %1483 = vmatprep.subr.mxu1 %v1843_v20 }
 0x2b0   :  { %1484 = vmatpush3.msra.mxu1 %v1843_v20 }
 0x2b1   :  { %1485 = vmatprep.subr.mxu1 %v1852_v21 }
 0x2b2   :  { %1486 = vmatpush3.msra.mxu1 %v1852_v21 }
 0x2b3   :  { %1487 = vmatprep.subr.mxu1 %v1861_v22 }
 0x2b4   :  { %1488 = vmatpush3.msra.mxu1 %v1861_v22 }
 0x2b5   :  { %1489 = vmatprep.subr.mxu1 %v1870_v23 }
 0x2b6   :  { %1490 = vmatpush3.msra.mxu1 %v1870_v23 }
 0x2b7   :  { %1491 = vmatprep.subr.mxu1 %v1879_v24 }
 0x2b8   :  { %1492 = vmatpush3.msra.mxu1 %v1879_v24 }
 0x2b9   :  { %1493 = vmatprep.subr.mxu1 %v1888_v25 }
 0x2ba   :  { %1494 = vmatpush3.msra.mxu1 %v1888_v25 }
 0x2bb   :  { %1495 = vmatprep.subr.mxu1 %v1912_v26 }
 0x2bc   :  { %1496 = vmatpush3.msra.mxu1 %v1912_v26 }
 0x2bd   :  { %1497 = vmatprep.subr.mxu1 %v1920_v27 }
 0x2be   :  { %1498 = vmatpush3.msra.mxu1 %v1920_v27 }
 0x2bf   :  { %1551 = vmatprep.subr.mxu1 %v1776_v6 }
 0x35f   :  { %v2073_v28 = vpop.f32.mrf.mxu1 }
 0x360   :  { %v641_v31 = vmul.f32 %v2073_v28, %v2073_v28  ;;  %1464 = vmatprep.mubr.f32.mxu0 %v2073_v28 }
 0x361   :  { %v1430_v53 = vpop.f32.mrf.mxu1 }
 0x362   :  { %1499 = vmatprep.mubr.f32.mxu1 %v641_v31 }
 0x363   :  { %v2078_v54 = vpop.f32.mrf.mxu1 }
 0x364   :  { %v642_v55 = vmul.f32 %v2078_v54, %v2078_v54  ;;  %1465 = vmatmul.mubr.f32.vlgmr.msra.gmra.mxu0 %v2078_v54 }
 0x365   :  { %v1431_v57 = vpop.f32.mrf.mxu1  ;;  %1503 = vmatpush3.msra.mxu0 %v1974_v33 }
 0x366   :  { %1500 = vmatmul.mubr.f32.vlgmr.msra.gmra.mxu1 %v642_v55  ;;  %1504 = vmatprep.subr.mxu0 %v1979_v34 }
 0x367   :  { %1552 = vmatpush3.msra.mxu1 %v1776_v6  ;;  %1583 = vmatprep.mubr.f32.mxu1 %v926_v56 }
 0x368   :  { %1553 = vmatprep.subr.mxu1 %v1781_v7  ;;  %1505 = vmatpush3.msra.mxu0 %v1979_v34 }
 0x369   :  { %1554 = vmatpush3.msra.mxu1 %v1781_v7  ;;  %1506 = vmatprep.subr.mxu0 %v1987_v35 }
 0x36a   :  { %1555 = vmatprep.subr.mxu1 %v1794_v10  ;;  %1507 = vmatpush3.msra.mxu0 %v1987_v35 }
 0x36b   :  { %1556 = vmatpush3.msra.mxu1 %v1794_v10  ;;  %1508 = vmatprep.subr.mxu0 %v1994_v36 }
 0x36c   :  { %1557 = vmatprep.subr.mxu1 %v1804_v14  ;;  %1509 = vmatpush3.msra.mxu0 %v1994_v36 }
 0x36d   :  { %1558 = vmatpush3.msra.mxu1 %v1804_v14  ;;  %1516 = vmatprep.subr.mxu0 %v1776_v6 }
 0x36e   :  { %1559 = vmatprep.subr.mxu1 %v1809_v15 }
 0x36f   :  { %1560 = vmatpush3.msra.mxu1 %v1809_v15 }
 0x370   :  { %1561 = vmatprep.subr.mxu1 %v1816_v16 }
 0x371   :  { %1562 = vmatpush3.msra.mxu1 %v1816_v16 }
 0x372   :  { %1563 = vmatprep.subr.mxu1 %v1826_v18 }
 0x373   :  { %1564 = vmatpush3.msra.mxu1 %v1826_v18 }
 0x374   :  { %1565 = vmatprep.subr.mxu1 %v1834_v19 }
 0x375   :  { %1566 = vmatpush3.msra.mxu1 %v1834_v19 }
 0x376   :  { %1567 = vmatprep.subr.mxu1 %v1843_v20 }
 0x377   :  { %1568 = vmatpush3.msra.mxu1 %v1843_v20 }
 0x378   :  { %1569 = vmatprep.subr.mxu1 %v1852_v21 }
 0x379   :  { %1570 = vmatpush3.msra.mxu1 %v1852_v21 }
 0x37a   :  { %1571 = vmatprep.subr.mxu1 %v1861_v22 }
 0x37b   :  { %1572 = vmatpush3.msra.mxu1 %v1861_v22 }
 0x37c   :  { %1573 = vmatprep.subr.mxu1 %v1870_v23 }
 0x37d   :  { %1574 = vmatpush3.msra.mxu1 %v1870_v23 }
 0x37e   :  { %1575 = vmatprep.subr.mxu1 %v1879_v24 }
 0x37f   :  { %1576 = vmatpush3.msra.mxu1 %v1879_v24 }
 0x380   :  { %1577 = vmatprep.subr.mxu1 %v1888_v25 }
 0x381   :  { %1578 = vmatpush3.msra.mxu1 %v1888_v25 }
 0x382   :  { %1579 = vmatprep.subr.mxu1 %v1912_v26 }
 0x383   :  { %1580 = vmatpush3.msra.mxu1 %v1912_v26 }
 0x384   :  { %1581 = vmatprep.subr.mxu1 %v1920_v27 }
 0x385   :  { %1582 = vmatpush3.msra.mxu1 %v1920_v27 }
 0x386   :  { %1584 = vmatmul.mubr.f32.vlgmr.msra.gmra.mxu1 %v927_v58 }
 0x424   :  { %v1466_v59 = vpop.f32.mrf.mxu0 }
 0x425   :  { %v640_v60 = vmul.f32 0.25, %v1466_v59 }
 0x426   :  { %v630_v61 = vpop.f32.mrf.mxu0  ;;  %v1501_v62 = vpop.f32.mrf.mxu1 }
 0x427   :  { %v721_v63 = vmul.f32 %v640_v60, %v640_v60  ;;  %v639_v0 = vmul.f32 0.25, %v630_v61  ;;  %v719_v1 = vmul.f32 0.25, %v1501_v62  ;;  %v731_v42 = vsub.f32 0.0, %v640_v60 }
 0x428   :  { %v709_v2 = vpop.f32.mrf.mxu1  ;;  %v1118_v61 = vsub.s32 4, %v2031_v8 }
 0x429   :  { %v720_v3 = vmul.f32 %v639_v0, %v639_v0  ;;  %v723_v4 = vsub.f32 %v719_v1, %v721_v63  ;;  %v718_v5 = vmul.f32 0.25, %v709_v2  ;;  %v730_v32 = vsub.f32 0.0, %v639_v0 }
 0x42a   :  { %v1119_v62 = vrot.slane %v2034_v11, %v1118_v61  ;;  %v1126_v63 = vsub.s32 5, %v2031_v8 }
 0x42b   :  { %v725_v9 = vmax.f32 %v723_v4, 0.0  ;;  %v722_v12 = vsub.f32 %v718_v5, %v720_v3 }
 0x42c   :  { %v1127_v3 = vrot.slane %v2034_v11, %v1126_v63 }
 0x42d   :  { %v724_v13 = vmax.f32 %v722_v12, 0.0  ;;  %v727_v17 = vadd.f32 1e-05, %v725_v9 }
 0x42f   :  { %v726_v29 = vadd.f32 1e-05, %v724_v13 }
 0x431   :  { %1632 = vrsqrt.f32 %v726_v29 }
 0x432   :  { %1634 = vrsqrt.f32 %v727_v17 }
 0x43e   :  { %v1633_v39 = vpop.eup %1632 }
 0x43f   :  { %v1635_v40 = vpop.eup %1634  ;;  %1510 = vmatprep.mubr.msk.f32.mxu0 %vm340_vm1, %v1633_v39  ;;  %v732_v41 = vmul.f32 %v1633_v39, %v730_v32 }
 0x440   :  { %1511 = vmatmul.mubr.msk.f32.vlgmr.msra.gmra.mxu0 %vm340_vm1, %v1635_v40  ;;  %v733_v37 = vmul.f32 %v1635_v40, %v731_v42 }
 0x441   :  { %1517 = vmatpush3.msra.mxu0 %v1776_v6  ;;  %1513 = vmatprep.mubr.msk.f32.mxu0 %vm340_vm1, %v732_v41  ;;  %v833_v6 = vsub.s32 2, %v2031_v8 }
 0x442   :  { %1518 = vmatprep.subr.mxu0 %v1781_v7 }
 0x443   :  { %1519 = vmatpush3.msra.mxu0 %v1781_v7  ;;  %v834_v7 = vrot.slane %v2034_v11, %v833_v6 }
 0x444   :  { %1520 = vmatprep.subr.mxu0 %v1794_v10  ;;  %1514 = vmatmul.mubr.msk.f32.gmra.mxu0 %vm340_vm1, %v733_v37 }
 0x445   :  { %1521 = vmatpush3.msra.mxu0 %v1794_v10  ;;  %1548 = vmatprep.mubr.f32.mxu0 %v1933_v30  ;;  %v841_v10 = vsub.s32 3, %v2031_v8 }
 0x446   :  { %1522 = vmatprep.subr.mxu0 %v1804_v14 }
 0x447   :  { %1523 = vmatpush3.msra.mxu0 %v1804_v14 }
 0x448   :  { %1524 = vmatprep.subr.mxu0 %v1809_v15 }
 0x449   :  { %1525 = vmatpush3.msra.mxu0 %v1809_v15 }
 0x44a   :  { %1526 = vmatprep.subr.mxu0 %v1816_v16 }
 0x44b   :  { %1527 = vmatpush3.msra.mxu0 %v1816_v16 }
 0x44c   :  { %1528 = vmatprep.subr.mxu0 %v1826_v18 }
 0x44d   :  { %1529 = vmatpush3.msra.mxu0 %v1826_v18  ;;  %v842_v18 = vrot.slane %v2034_v11, %v841_v10 }
 0x44e   :  { %1530 = vmatprep.subr.mxu0 %v1834_v19 }
 0x44f   :  { %1531 = vmatpush3.msra.mxu0 %v1834_v19 }
 0x450   :  { %1532 = vmatprep.subr.mxu0 %v1843_v20 }
 0x451   :  { %1533 = vmatpush3.msra.mxu0 %v1843_v20 }
 0x452   :  { %1534 = vmatprep.subr.mxu0 %v1852_v21 }
 0x453   :  { %1535 = vmatpush3.msra.mxu0 %v1852_v21 }
 0x454   :  { %1536 = vmatprep.subr.mxu0 %v1861_v22 }
 0x455   :  { %1537 = vmatpush3.msra.mxu0 %v1861_v22 }
 0x456   :  { %1538 = vmatprep.subr.mxu0 %v1870_v23 }
 0x457   :  { %1539 = vmatpush3.msra.mxu0 %v1870_v23 }
 0x458   :  { %1540 = vmatprep.subr.mxu0 %v1879_v24 }
 0x459   :  { %1541 = vmatpush3.msra.mxu0 %v1879_v24 }
 0x45a   :  { %1542 = vmatprep.subr.mxu0 %v1888_v25 }
 0x45b   :  { %1543 = vmatpush3.msra.mxu0 %v1888_v25 }
 0x45c   :  { %1544 = vmatprep.subr.mxu0 %v1912_v26 }
 0x45d   :  { %1545 = vmatpush3.msra.mxu0 %v1912_v26 }
 0x45e   :  { %1546 = vmatprep.subr.mxu0 %v1920_v27 }
 0x45f   :  { %1547 = vmatpush3.msra.mxu0 %v1920_v27 }
 0x460   :  { %1549 = vmatmul.mubr.f32.vlgmr.msra.gmra.mxu0 %v2000_v38  ;;  %1586 = vmatprep.subr.mxu0 %v1974_v33 }
 0x461   :  { %1587 = vmatpush3.msra.mxu0 %v1974_v33 }
 0x462   :  { %1588 = vmatprep.subr.mxu0 %v1979_v34 }
 0x463   :  { %1589 = vmatpush3.msra.mxu0 %v1979_v34 }
 0x464   :  { %1590 = vmatprep.subr.mxu0 %v1987_v35 }
 0x465   :  { %1591 = vmatpush3.msra.mxu0 %v1987_v35  ;;  %v1585_v35 = vpop.f32.mrf.mxu1 }
 0x466   :  { %1592 = vmatprep.subr.mxu0 %v1994_v36  ;;  %v1004_v46 = vmul.f32 0.25, %v1585_v35 }
 0x467   :  { %1593 = vmatpush3.msra.mxu0 %v1994_v36  ;;  %v994_v44 = vpop.f32.mrf.mxu1 }
 0x468   :  { %v1003_v49 = vmul.f32 0.25, %v994_v44 }
 0x500   :  { %v1512_v14 = vpop.f32.mrf.mxu0 }
 0x501   :  { %v836_v16 = vmul.f32 %v1512_v14, %v834_v7 }
 0x502   :  { %v812_v15 = vpop.f32.mrf.mxu0 }
 0x503   :  { %v835_v20 = vmul.f32 %v834_v7, %v812_v15  ;;  %v846_v23 = vmul.f32 %v836_v16, %v2078_v54 }
 0x504   :  { %v1515_v19 = vpop.f32.mrf.mxu0 }
 0x505   :  { %v838_v21 = vmul.f32 %v1515_v19, %v834_v7  ;;  %v845_v26 = vmul.f32 %v835_v20, %v2073_v28 }
 0x506   :  { %v822_v22 = vpop.f32.mrf.mxu0 }
 0x507   :  { %v844_v24 = vadd.f32 %v842_v18, %v838_v21  ;;  %v837_v25 = vmul.f32 %v834_v7, %v822_v22 }
 0x509   :  { %v848_v27 = vadd.f32 %v846_v23, %v844_v24  ;;  %v843_v33 = vadd.f32 %v842_v18, %v837_v25 }
 0x50b   :  { %v847_v34 = vadd.f32 %v845_v26, %v843_v33 }
 0x520   :  { %v1550_v36 = vpop.f32.mrf.mxu0 }
 0x521   :  { %v925_v43 = vmul.f32 0.25, %v1550_v36 }
 0x522   :  { %v915_v45 = vpop.f32.mrf.mxu0 }
 0x523   :  { %v1006_v47 = vmul.f32 %v925_v43, %v925_v43  ;;  %v924_v48 = vmul.f32 0.25, %v915_v45  ;;  %v1016_v59 = vsub.f32 0.0, %v925_v43 }
 0x525   :  { %v1008_v50 = vsub.f32 %v1004_v46, %v1006_v47  ;;  %v1005_v51 = vmul.f32 %v924_v48, %v924_v48  ;;  %v1015_v28 = vsub.f32 0.0, %v924_v48 }
 0x527   :  { %v1010_v52 = vmax.f32 %v1008_v50, 0.0  ;;  %v1007_v31 = vsub.f32 %v1003_v49, %v1005_v51 }
 0x529   :  { %v1009_v53 = vmax.f32 %v1007_v31, 0.0  ;;  %v1012_v54 = vadd.f32 1e-05, %v1010_v52 }
 0x52b   :  { %v1011_v55 = vadd.f32 1e-05, %v1009_v53 }
 0x52d   :  { %1636 = vrsqrt.f32 %v1011_v55 }
 0x52e   :  { %1638 = vrsqrt.f32 %v1012_v54 }
 0x53a   :  { %v1637_v56 = vpop.eup %1636 }
 0x53b   :  { %v1639_v57 = vpop.eup %1638  ;;  %v1017_v58 = vmul.f32 %v1637_v56, %v1015_v28  ;;  %1594 = vmatprep.mubr.msk.f32.mxu0 %vm340_vm1, %v1637_v56 }
 0x53c   :  { %1595 = vmatmul.mubr.msk.f32.vlgmr.msra.gmra.mxu0 %vm340_vm1, %v1639_v57  ;;  %v1018_v60 = vmul.f32 %v1639_v57, %v1016_v59 }
 0x53d   :  { %1597 = vmatprep.mubr.msk.f32.mxu0 %vm340_vm1, %v1017_v58 }
 0x540   :  { %1598 = vmatmul.mubr.msk.f32.gmra.mxu0 %vm340_vm1, %v1018_v60 }
 0x5fc   :  { %v1596_v0 = vpop.f32.mrf.mxu0 }
 0x5fd   :  { %v1121_v2 = vmul.f32 %v1596_v0, %v1119_v62 }
 0x5fe   :  { %v1097_v1 = vpop.f32.mrf.mxu0 }
 0x5ff   :  { %v1120_v5 = vmul.f32 %v1119_v62, %v1097_v1  ;;  %v1131_v13 = vmul.f32 %v1121_v2, %v2000_v38 }
 0x600   :  { %v1599_v4 = vpop.f32.mrf.mxu0 }
 0x601   :  { %v1123_v9 = vmul.f32 %v1599_v4, %v1119_v62  ;;  %v1130_v32 = vmul.f32 %v1120_v5, %v1933_v30 }
 0x602   :  { %v1107_v12 = vpop.f32.mrf.mxu0 }
 0x603   :  { %v1129_v17 = vadd.f32 %v1127_v3, %v1123_v9  ;;  %v1122_v29 = vmul.f32 %v1119_v62, %v1107_v12 }
 0x605   :  { %v1133_v39 = vadd.f32 %v1131_v13, %v1129_v17  ;;  %v1128_v40 = vadd.f32 %v1127_v3, %v1122_v29 }
 0x607   :  { %v1132_v41 = vadd.f32 %v1130_v32, %v1128_v40  ;;  %v1135_v42 = vadd.f32 %v1133_v39, %v848_v27 }
 0x609   :  { %v1134_v8 = vadd.f32 %v1132_v41, %v847_v34  ;;  %v1137_v37 = vmax.f32 %v1135_v42, 0.0 }
 0x60b   :  { %v1136_v6 = vmax.f32 %v1134_v8, 0.0  ;;  %1139 = vst [vmem:[#allocation7 + $0x8] sm:$0xff] %v1137_v37 }
 0x60d   :  { %1138 = vst [vmem:[#allocation7] sm:$0xff] %v1136_v6 }
 0x60e   :  { %1691 = shalt.err (!%p1688_p0)
}
 0x60f   :  { %1151 = dma.vmem_to_hbm [thread:$0]  %s1146_s29, 256, %s2199_s6, [#allocation4], %s1707_s24, %s1707_s24, %s1708_s25  }
 0x610   :  { %1704 = dma.done.wait [#allocation4], 256  }
 0x611   :  { %1705 = vsyncadd [#allocation4], 4294967040 }
 0x612   :  { %1155 = vsyncpa [#allocation3], 1 }
 0x613   :  { %1156 = vsyncpa [#allocation6], 1 }
 0x614   :  { %1157 = vsyncpa [#allocation4], 1 }

// kernel: tpu_custom_call.1
= control target key start
LH: loop header
LB: loop body
LE: loop exit
PB: predicated region body
PF: predicated region fallthrough
CT: control target
= control target key end

     0   :  { %11 = vsyncpa [#allocation3], 0  ;;  %s2193_s0 = inlined_call_operand.hbm [shape: f32[16,64], index: 0, kind: input, shape index: {}]   ;;  %s2194_s1 = inlined_call_operand.vmem [shape: bf16[64,256], index: 1, kind: input, shape index: {}]   ;;  %s2195_s2 = inlined_call_operand.vmem [shape: bf16[128,128], index: 2, kind: input, shape index: {}]   ;;  %s2196_s3 = inlined_call_operand.hbm [shape: f32[8,128], index: 3, kind: input, shape index: {}]   ;;  %s2197_s4 = inlined_call_operand.vmem [shape: f32[128,32], index: 4, kind: input, shape index: {}]   ;;  %s2198_s5 = inlined_call_operand.vmem [shape: f32[32,128], index: 5, kind: input, shape index: {}]   ;;  %s2199_s6 = inlined_call_operand.hbm [shape: f32[16,128], index: 6, kind: output, shape index: {}]  }
   0x1   :  { %12 = vsyncpa [#allocation6], 0 }
   0x2   :  { %13 = vsyncpa [#allocation4], 0  ;;  %s1706_s21 = smov [#allocation2]  }
   0x3   :  { %s19_s22 = sshll.u32 %s1706_s21, 4  ;;  %s20_s22 = int_to_ptr.vmem [resolvable:$true] %s19_s22 }
   0x4   :  { %s1648_s23 = scalar_lea.vmem %s20_s22, 256  ;;  %p1653_p1 = scmp.lt.s32.totalorder %s20_s22, %s20_s22 }
   0x5   :  { %p1649_p0 = scmp.ne.s32.totalorder %s20_s22, %s1648_s23  ;;  %p1654_p2 = scmp.lt.s32.totalorder %s1648_s23, %s1648_s23 }
   0x7   :  { %p1655_p3 = por %p1654_p2, %p1653_p1 }
   0x9   :  { %p1656_p4 = pnand %p1655_p3, %p1649_p0 }
   0xb   :  { %1659 = shalt.err (!%p1656_p4)
}
   0xc   :  { %s1707_s24 = smov 128   ;;  %s1708_s25 = smov 8  }
   0xd   :  { %25 = dma.hbm_to_vmem [thread:$0]  %s2193_s0, 256, %s20_s22, [#allocation3], %s1707_s24, %s1707_s24, %s1708_s25  }
   0xe   :  { %s1709_s28 = smov [#allocation5]  }
   0xf   :  { %s36_s29 = sshll.u32 %s1709_s28, 4  ;;  %s37_s29 = int_to_ptr.vmem [resolvable:$true] %s36_s29 }
  0x10   :  { %s1668_s30 = scalar_lea.vmem %s37_s29, 128  ;;  %p1673_p6 = scmp.lt.s32.totalorder %s37_s29, %s37_s29 }
  0x11   :  { %p1669_p5 = scmp.ne.s32.totalorder %s37_s29, %s1668_s30  ;;  %p1674_p7 = scmp.lt.s32.totalorder %s1668_s30, %s1668_s30 }
  0x13   :  { %p1675_p8 = por %p1674_p7, %p1673_p6 }
  0x15   :  { %p1676_p9 = pnand %p1675_p8, %p1669_p5 }
  0x17   :  { %1679 = shalt.err (!%p1676_p9)
}
  0x18   :  { %39 = dma.hbm_to_vmem [thread:$0]  %s2196_s3, 128, %s37_s29, [#allocation6]  }
  0x19   :  { %1700 = dma.done.wait [#allocation3], 256  }
  0x1a   :  { %1701 = vsyncadd [#allocation3], 4294967040 }
  0x1b   :  { %1702 = dma.done.wait [#allocation6], 128  }
  0x1c   :  { %1703 = vsyncadd [#allocation6], 4294967168  ;;  %v1710_v0 = vmov 0   ;;  %v1608_v1 = vld [vmem:[%s2194_s1 + $0x34] ss:$8 sps:$4 sm:$0xff]   ;;  %v1794_v10 = vld [vmem:[%s2197_s4 + $0x68] sm:$0xff] }
  0x1d   :  { %159 = vmatprep.mubr.bf16.mxu0 %v1710_v0  ;;  %v1610_v2 = vld [vmem:[%s2194_s1 + $0x30] ss:$8 sps:$4 sm:$0xff]   ;;  %135 = vmatprep.subr.bf16.mxu0 %v1608_v1  ;;  %v1611_v3 = vld [vmem:[%s2194_s1 + $0x24] ss:$8 sps:$4 sm:$0xff]   ;;  %v1613_v4 = vld [vmem:[%s2194_s1 + $0x20] ss:$8 sps:$4 sm:$0xff]  }
  0x1e   :  { %136 = vmatpush1.bf16.msra.mxu0 %v1610_v2  ;;  %v1614_v5 = vld [vmem:[%s2194_s1 + $0x14] ss:$8 sps:$4 sm:$0xff]   ;;  %v1616_v8 = vld [vmem:[%s2194_s1 + $0x10] ss:$8 sps:$4 sm:$0xff]   ;;  %v1617_v9 = vld [vmem:[%s2194_s1 + $0x4] ss:$8 sps:$4 sm:$0xff]  }
  0x1f   :  { %137 = vmatprep.subr.bf16.mxu0 %v1611_v3  ;;  %v1776_v6 = vld [vmem:[%s2197_s4 + $0x78] sm:$0xff]  ;;  %v1781_v7 = vld [vmem:[%s2197_s4 + $0x70] sm:$0xff]  ;;  %v1619_v11 = vld [vmem:[%s2194_s1] ss:$8 sps:$4 sm:$0xff]   ;;  %vm123_vm0 = vcmask 523264   ;;  %v1711_v37 = vmov 0.0  }
  0x20   :  { %1328 = vmatprep.subr.mxu1 %v1776_v6  ;;  %v72_v12 = vld [vmem:[#allocation2] sm:$0xff]  ;;  %v73_v13 = vld [vmem:[#allocation2 + $0x8] sm:$0xff]  ;;  %v1809_v15 = vld [vmem:[%s2197_s4 + $0x58] sm:$0xff]  ;;  %vm340_vm1 = vcmask 261120   ;;  %vm1712_vm2 = vmmov 0  }
  0x21   :  { %1329 = vmatpush3.msra.mxu1 %v1776_v6  ;;  %v1804_v14 = vld [vmem:[%s2197_s4 + $0x60] sm:$0xff]  ;;  %v1816_v16 = vld [vmem:[%s2197_s4 + $0x50] sm:$0xff]  ;;  %v74_v17 = vpack.c.bf16 %v73_v13, %v72_v12  ;;  %v1826_v18 = vld [vmem:[%s2197_s4 + $0x48] sm:$0xff] }
  0x22   :  { %138 = vmatpush1.bf16.msra.mxu0 %v1613_v4  ;;  %1330 = vmatprep.subr.mxu1 %v1781_v7  ;;  %v1834_v19 = vld [vmem:[%s2197_s4 + $0x40] sm:$0xff]  ;;  %v1843_v20 = vld [vmem:[%s2197_s4 + $0x38] sm:$0xff]  ;;  %v1852_v21 = vld [vmem:[%s2197_s4 + $0x30] sm:$0xff] }
  0x23   :  { %139 = vmatprep.subr.bf16.mxu0 %v1614_v5  ;;  %1331 = vmatpush3.msra.mxu1 %v1781_v7  ;;  %v1861_v22 = vld [vmem:[%s2197_s4 + $0x28] sm:$0xff]  ;;  %v1870_v23 = vld [vmem:[%s2197_s4 + $0x20] sm:$0xff]  ;;  %v1879_v24 = vld [vmem:[%s2197_s4 + $0x18] sm:$0xff]  ;;  %v438_v5 = vlaneseq }
  0x24   :  { %1332 = vmatprep.subr.mxu1 %v1794_v10  ;;  %v1888_v25 = vld [vmem:[%s2197_s4 + $0x10] sm:$0xff]  ;;  %v1912_v26 = vld [vmem:[%s2197_s4 + $0x8] sm:$0xff]  ;;  %v1920_v27 = vld [vmem:[%s2197_s4] sm:$0xff] }
  0x25   :  { %1333 = vmatpush3.msra.mxu1 %v1794_v10  ;;  %v1974_v33 = vld [vmem:[%s2198_s5 + $0x18] sm:$0xff]  ;;  %v1979_v34 = vld [vmem:[%s2198_s5 + $0x10] sm:$0xff]  ;;  %v1987_v35 = vld [vmem:[%s2198_s5 + $0x8] sm:$0xff] }
  0x26   :  { %140 = vmatpush1.bf16.msra.mxu0 %v1616_v8  ;;  %1334 = vmatprep.subr.mxu1 %v1804_v14  ;;  %v1994_v36 = vld [vmem:[%s2198_s5] sm:$0xff]  ;;  %v1620_v56 = vld [vmem:[%s2195_s2 + $0x38] sm:$0xff]   ;;  %v1621_v61 = vld [vmem:[%s2195_s2 + $0x30] sm:$0xff]   ;;  %v2031_v8 = vshrl.u32 %v438_v5, 7 }
  0x27   :  { %141 = vmatprep.subr.bf16.mxu0 %v1617_v9  ;;  %1335 = vmatpush3.msra.mxu1 %v1804_v14  ;;  %v1622_v63 = vld [vmem:[%s2195_s2 + $0x28] sm:$0xff]   ;;  %v1623_v0 = vld [vmem:[%s2195_s2 + $0x20] sm:$0xff]   ;;  %v1624_v1 = vld [vmem:[%s2195_s2 + $0x18] sm:$0xff]  }
  0x28   :  { %1336 = vmatprep.subr.mxu1 %v1809_v15  ;;  %v1625_v2 = vld [vmem:[%s2195_s2 + $0x10] sm:$0xff]   ;;  %v1626_v3 = vld [vmem:[%s2195_s2 + $0x8] sm:$0xff]   ;;  %v1627_v4 = vld [vmem:[%s2195_s2] sm:$0xff]   ;;  %v440_v9 = vsub.s32 0, %v2031_v8  ;;  %v448_v13 = vsub.s32 1, %v2031_v8  ;;  %s1713_s2 = smov [#allocation7]  }
  0x29   :  { %1337 = vmatpush3.msra.mxu1 %v1809_v15  ;;  %s1145_s29 = sshll.u32 %s1713_s2, 4  ;;  %s1146_s29 = int_to_ptr.vmem [resolvable:$true] %s1145_s29 }
  0x2a   :  { %142 = vmatpush1.bf16.msra.mxu0 %v1619_v11  ;;  %1338 = vmatprep.subr.mxu1 %v1816_v16  ;;  %v2034_v11 = vld [vmem:[#allocation5] sm:$0xff]  ;;  %s1680_s30 = scalar_lea.vmem %s1146_s29, 256  ;;  %p1685_p11 = scmp.lt.s32.totalorder %s1146_s29, %s1146_s29 }
  0x2b   :  { %1363 = vmatprep.subr.mxu0 %v1776_v6  ;;  %1339 = vmatpush3.msra.mxu1 %v1816_v16  ;;  %v441_v12 = vrot.slane %v2034_v11, %v440_v9  ;;  %p1681_p10 = scmp.ne.s32.totalorder %s1146_s29, %s1680_s30  ;;  %p1686_p12 = scmp.lt.s32.totalorder %s1680_s30, %s1680_s30 }
  0x2c   :  { %1340 = vmatprep.subr.mxu1 %v1826_v18 }
  0x2d   :  { %1166 = vmatmul.mubr.msk.bf16.vlgmr.msra.gmra.mxu0 %vm123_vm0, %v74_v17  ;;  %1341 = vmatpush3.msra.mxu1 %v1826_v18  ;;  %p1687_p13 = por %p1686_p12, %p1685_p11 }
  0x2e   :  { %1364 = vmatpush3.msra.mxu0 %v1776_v6  ;;  %1342 = vmatprep.subr.mxu1 %v1834_v19 }
  0x2f   :  { %1365 = vmatprep.subr.mxu0 %v1781_v7  ;;  %1343 = vmatpush3.msra.mxu1 %v1834_v19  ;;  %p1688_p0 = pnand %p1687_p13, %p1681_p10 }
  0x30   :  { %1366 = vmatpush3.msra.mxu0 %v1781_v7  ;;  %1344 = vmatprep.subr.mxu1 %v1843_v20 }
  0x31   :  { %1367 = vmatprep.subr.mxu0 %v1794_v10  ;;  %1345 = vmatpush3.msra.mxu1 %v1843_v20 }
  0x32   :  { %1368 = vmatpush3.msra.mxu0 %v1794_v10  ;;  %1346 = vmatprep.subr.mxu1 %v1852_v21 }
  0x33   :  { %1369 = vmatprep.subr.mxu0 %v1804_v14  ;;  %1347 = vmatpush3.msra.mxu1 %v1852_v21 }
  0x34   :  { %1370 = vmatpush3.msra.mxu0 %v1804_v14  ;;  %1348 = vmatprep.subr.mxu1 %v1861_v22 }
  0x35   :  { %1371 = vmatprep.subr.mxu0 %v1809_v15  ;;  %1349 = vmatpush3.msra.mxu1 %v1861_v22 }
  0x36   :  { %1372 = vmatpush3.msra.mxu0 %v1809_v15  ;;  %1350 = vmatprep.subr.mxu1 %v1870_v23 }
  0x37   :  { %1373 = vmatprep.subr.mxu0 %v1816_v16  ;;  %1351 = vmatpush3.msra.mxu1 %v1870_v23 }
  0x38   :  { %1374 = vmatpush3.msra.mxu0 %v1816_v16  ;;  %1352 = vmatprep.subr.mxu1 %v1879_v24 }
  0x39   :  { %1375 = vmatprep.subr.mxu0 %v1826_v18  ;;  %1353 = vmatpush3.msra.mxu1 %v1879_v24 }
  0x3a   :  { %1376 = vmatpush3.msra.mxu0 %v1826_v18  ;;  %1354 = vmatprep.subr.mxu1 %v1888_v25 }
  0x3b   :  { %1377 = vmatprep.subr.mxu0 %v1834_v19  ;;  %1355 = vmatpush3.msra.mxu1 %v1888_v25 }
  0x3c   :  { %1378 = vmatpush3.msra.mxu0 %v1834_v19  ;;  %1356 = vmatprep.subr.mxu1 %v1912_v26 }
  0x3d   :  { %1379 = vmatprep.subr.mxu0 %v1843_v20  ;;  %1357 = vmatpush3.msra.mxu1 %v1912_v26 }
  0x3e   :  { %1380 = vmatpush3.msra.mxu0 %v1843_v20  ;;  %1358 = vmatprep.subr.mxu1 %v1920_v27 }
  0x3f   :  { %1381 = vmatprep.subr.mxu0 %v1852_v21  ;;  %1359 = vmatpush3.msra.mxu1 %v1920_v27 }
  0x40   :  { %1382 = vmatpush3.msra.mxu0 %v1852_v21  ;;  %1398 = vmatprep.subr.mxu1 %v1974_v33 }
  0x41   :  { %1383 = vmatprep.subr.mxu0 %v1861_v22 }
  0x42   :  { %1384 = vmatpush3.msra.mxu0 %v1861_v22 }
  0x43   :  { %1385 = vmatprep.subr.mxu0 %v1870_v23 }
  0x44   :  { %1386 = vmatpush3.msra.mxu0 %v1870_v23 }
  0x45   :  { %1387 = vmatprep.subr.mxu0 %v1879_v24 }
  0x46   :  { %1388 = vmatpush3.msra.mxu0 %v1879_v24 }
  0x47   :  { %1389 = vmatprep.subr.mxu0 %v1888_v25 }
  0x48   :  { %1390 = vmatpush3.msra.mxu0 %v1888_v25 }
  0x49   :  { %1391 = vmatprep.subr.mxu0 %v1912_v26 }
  0x4a   :  { %1392 = vmatpush3.msra.mxu0 %v1912_v26 }
  0x4b   :  { %1393 = vmatprep.subr.mxu0 %v1920_v27 }
  0x4c   :  { %1394 = vmatpush3.msra.mxu0 %v1920_v27 }
  0x4d   :  { %1432 = vmatprep.subr.mxu0 %v1776_v6 }
  0xed   :  { %v1928_v28 = vpop.f32.mrf.mxu0 }
  0xee   :  { %v247_v29 = vmul.f32 %v1928_v28, %v1928_v28  ;;  %1360 = vmatprep.mubr.f32.mxu1 %v1928_v28 }
  0xef   :  { %v1933_v30 = vpop.f32.mrf.mxu0 }
  0xf0   :  { %1395 = vmatprep.mubr.f32.mxu0 %v247_v29 }
  0xf1   :  { %v1935_v31 = vpop.f32.mrf.mxu0 }
  0xf2   :  { %v248_v32 = vmul.f32 %v1935_v31, %v1935_v31  ;;  %1361 = vmatmul.mubr.f32.vlgmr.msra.gmra.mxu1 %v1935_v31 }
  0xf3   :  { %1399 = vmatpush3.msra.mxu1 %v1974_v33  ;;  %v2000_v38 = vpop.f32.mrf.mxu0 }
  0xf4   :  { %1396 = vmatmul.mubr.f32.vlgmr.msra.gmra.mxu0 %v248_v32  ;;  %1400 = vmatprep.subr.mxu1 %v1979_v34 }
  0xf5   :  { %1433 = vmatpush3.msra.mxu0 %v1776_v6  ;;  %1401 = vmatpush3.msra.mxu1 %v1979_v34 }
  0xf6   :  { %1434 = vmatprep.subr.mxu0 %v1781_v7  ;;  %1402 = vmatprep.subr.mxu1 %v1987_v35 }
  0xf7   :  { %1435 = vmatpush3.msra.mxu0 %v1781_v7  ;;  %1403 = vmatpush3.msra.mxu1 %v1987_v35 }
  0xf8   :  { %1436 = vmatprep.subr.mxu0 %v1794_v10  ;;  %1404 = vmatprep.subr.mxu1 %v1994_v36 }
  0xf9   :  { %1437 = vmatpush3.msra.mxu0 %v1794_v10  ;;  %1405 = vmatpush3.msra.mxu1 %v1994_v36 }
  0xfa   :  { %1438 = vmatprep.subr.mxu0 %v1804_v14  ;;  %1412 = vmatprep.subr.bf16.mxu1 %v1711_v37 }
  0xfb   :  { %1439 = vmatpush3.msra.mxu0 %v1804_v14 }
  0xfc   :  { %1440 = vmatprep.subr.mxu0 %v1809_v15 }
  0xfd   :  { %1441 = vmatpush3.msra.mxu0 %v1809_v15 }
  0xfe   :  { %1442 = vmatprep.subr.mxu0 %v1816_v16 }
  0xff   :  { %1443 = vmatpush3.msra.mxu0 %v1816_v16 }
 0x100   :  { %1444 = vmatprep.subr.mxu0 %v1826_v18 }
 0x101   :  { %1445 = vmatpush3.msra.mxu0 %v1826_v18 }
 0x102   :  { %1446 = vmatprep.subr.mxu0 %v1834_v19 }
 0x103   :  { %1447 = vmatpush3.msra.mxu0 %v1834_v19 }
 0x104   :  { %1448 = vmatprep.subr.mxu0 %v1843_v20 }
 0x105   :  { %1449 = vmatpush3.msra.mxu0 %v1843_v20 }
 0x106   :  { %1450 = vmatprep.subr.mxu0 %v1852_v21 }
 0x107   :  { %1451 = vmatpush3.msra.mxu0 %v1852_v21 }
 0x108   :  { %1452 = vmatprep.subr.mxu0 %v1861_v22 }
 0x109   :  { %1453 = vmatpush3.msra.mxu0 %v1861_v22 }
 0x10a   :  { %1454 = vmatprep.subr.mxu0 %v1870_v23 }
 0x10b   :  { %1455 = vmatpush3.msra.mxu0 %v1870_v23 }
 0x10c   :  { %1456 = vmatprep.subr.mxu0 %v1879_v24 }
 0x10d   :  { %1457 = vmatpush3.msra.mxu0 %v1879_v24 }
 0x10e   :  { %1458 = vmatprep.subr.mxu0 %v1888_v25 }
 0x10f   :  { %1459 = vmatpush3.msra.mxu0 %v1888_v25 }
 0x110   :  { %1460 = vmatprep.subr.mxu0 %v1912_v26 }
 0x111   :  { %1461 = vmatpush3.msra.mxu0 %v1912_v26 }
 0x112   :  { %1462 = vmatprep.subr.mxu0 %v1920_v27 }
 0x113   :  { %1463 = vmatpush3.msra.mxu0 %v1920_v27 }
 0x114   :  { %1502 = vmatprep.subr.mxu0 %v1974_v33 }
 0x1b2   :  { %v1362_v39 = vpop.f32.mrf.mxu1 }
 0x1b3   :  { %v246_v40 = vmul.f32 0.25, %v1362_v39  ;;  %v449_v39 = vrot.slane %v2034_v11, %v448_v13 }
 0x1b4   :  { %v236_v41 = vpop.f32.mrf.mxu1  ;;  %v1397_v42 = vpop.f32.mrf.mxu0 }
 0x1b5   :  { %v327_v43 = vmul.f32 %v246_v40, %v246_v40  ;;  %v245_v44 = vmul.f32 0.25, %v236_v41  ;;  %v325_v45 = vmul.f32 0.25, %v1397_v42  ;;  %v337_v60 = vsub.f32 0.0, %v246_v40 }
 0x1b6   :  { %v315_v46 = vpop.f32.mrf.mxu0 }
 0x1b7   :  { %v326_v47 = vmul.f32 %v245_v44, %v245_v44  ;;  %v329_v48 = vsub.f32 %v325_v45, %v327_v43  ;;  %v324_v49 = vmul.f32 0.25, %v315_v46  ;;  %v336_v55 = vsub.f32 0.0, %v245_v44 }
 0x1b9   :  { %v331_v50 = vmax.f32 %v329_v48, 0.0  ;;  %v328_v51 = vsub.f32 %v324_v49, %v326_v47 }
 0x1bb   :  { %v330_v52 = vmax.f32 %v328_v51, 0.0  ;;  %v333_v53 = vadd.f32 1e-05, %v331_v50 }
 0x1bd   :  { %v332_v54 = vadd.f32 1e-05, %v330_v52 }
 0x1bf   :  { %1628 = vrsqrt.f32 %v332_v54 }
 0x1c0   :  { %1630 = vrsqrt.f32 %v333_v53 }
 0x1cc   :  { %v1629_v57 = vpop.eup %1628 }
 0x1cd   :  { %v1631_v58 = vpop.eup %1630  ;;  %1406 = vmatprep.mubr.msk.f32.mxu1 %vm340_vm1, %v1629_v57  ;;  %v338_v59 = vmul.f32 %v1629_v57, %v336_v55 }
 0x1ce   :  { %1407 = vmatmul.mubr.msk.f32.vlgmr.msra.gmra.mxu1 %vm340_vm1, %v1631_v58  ;;  %v339_v62 = vmul.f32 %v1631_v58, %v337_v60  ;;  %v927_v58 = vmul.f32 %v2000_v38, %v2000_v38 }
 0x1cf   :  { %1409 = vmatprep.mubr.msk.f32.mxu1 %vm340_vm1, %v338_v59  ;;  %1413 = vmatpush3.bf16.msra.mxu1 %v1620_v56  ;;  %v926_v56 = vmul.f32 %v1933_v30, %v1933_v30 }
 0x1d0   :  { %1414 = vmatprep.subr.bf16.mxu1 %v1711_v37 }
 0x1d2   :  { %1410 = vmatmul.mubr.msk.f32.gmra.mxu1 %vm340_vm1, %v339_v62 }
 0x1d3   :  { %1415 = vmatpush3.bf16.msra.mxu1 %v1621_v61  ;;  %1428 = vmatprep.mubr.msk.bf16.mxu1 %vm1712_vm2, %v1711_v37 }
 0x1d4   :  { %1416 = vmatprep.subr.bf16.mxu1 %v1711_v37 }
 0x1d7   :  { %1417 = vmatpush3.bf16.msra.mxu1 %v1622_v63 }
 0x1d8   :  { %1418 = vmatprep.subr.bf16.mxu1 %v1711_v37 }
 0x1db   :  { %1419 = vmatpush3.bf16.msra.mxu1 %v1623_v0 }
 0x1dc   :  { %1420 = vmatprep.subr.bf16.mxu1 %v1711_v37 }
 0x1df   :  { %1421 = vmatpush3.bf16.msra.mxu1 %v1624_v1 }
 0x1e0   :  { %1422 = vmatprep.subr.bf16.mxu1 %v1711_v37 }
 0x1e3   :  { %1423 = vmatpush3.bf16.msra.mxu1 %v1625_v2 }
 0x1e4   :  { %1424 = vmatprep.subr.bf16.mxu1 %v1711_v37 }
 0x1e7   :  { %1425 = vmatpush3.bf16.msra.mxu1 %v1626_v3 }
 0x1e8   :  { %1426 = vmatprep.subr.bf16.mxu1 %v1711_v37 }
 0x1eb   :  { %1427 = vmatpush3.bf16.msra.mxu1 %v1627_v4 }
 0x1ec   :  { %1467 = vmatprep.subr.mxu1 %v1776_v6 }
 0x28e   :  { %v1408_v17 = vpop.f32.mrf.mxu1 }
 0x28f   :  { %v443_v32 = vmul.f32 %v1408_v17, %v441_v12 }
 0x290   :  { %v419_v29 = vpop.f32.mrf.mxu1 }
 0x291   :  { %v442_v41 = vmul.f32 %v441_v12, %v419_v29  ;;  %v453_v43 = vmul.f32 %v443_v32, %v1935_v31 }
 0x292   :  { %v1411_v40 = vpop.f32.mrf.mxu1 }
 0x293   :  { %v445_v42 = vmul.f32 %v1411_v40, %v441_v12  ;;  %v452_v46 = vmul.f32 %v442_v41, %v1928_v28 }
 0x294   :  { %v429_v37 = vpop.f32.mrf.mxu1 }
 0x295   :  { %v451_v44 = vadd.f32 %v449_v39, %v445_v42  ;;  %v444_v45 = vmul.f32 %v441_v12, %v429_v37 }
 0x297   :  { %v455_v47 = vadd.f32 %v453_v43, %v451_v44  ;;  %v450_v48 = vadd.f32 %v449_v39, %v444_v45 }
 0x299   :  { %v454_v49 = vadd.f32 %v452_v46, %v450_v48  ;;  %v457_v50 = vmax.f32 %v455_v47, 0.0 }
 0x29b   :  { %v456_v51 = vmax.f32 %v454_v49, 0.0 }
 0x29d   :  { %v458_v52 = vpack.c.bf16 %v457_v50, %v456_v51 }
 0x29f   :  { %1429 = vmatmul.mubr.bf16.vlgmr.msra.gmra.mxu1 %v458_v52 }
 0x2a0   :  { %1468 = vmatpush3.msra.mxu1 %v1776_v6 }
 0x2a1   :  { %1469 = vmatprep.subr.mxu1 %v1781_v7 }
 0x2a2   :  { %1470 = vmatpush3.msra.mxu1 %v1781_v7 }
 0x2a3   :  { %1471 = vmatprep.subr.mxu1 %v1794_v10 }
 0x2a4   :  { %1472 = vmatpush3.msra.mxu1 %v1794_v10 }
 0x2a5   :  { %1473 = vmatprep.subr.mxu1 %v1804_v14 }
 0x2a6   :  { %1474 = vmatpush3.msra.mxu1 %v1804_v14 }
 0x2a7   :  { %1475 = vmatprep.subr.mxu1 %v1809_v15 }
 0x2a8   :  { %1476 = vmatpush3.msra.mxu1 %v1809_v15 }
 0x2a9   :  { %1477 = vmatprep.subr.mxu1 %v1816_v16 }
 0x2aa   :  { %1478 = vmatpush3.msra.mxu1 %v1816_v16 }
 0x2ab   :  { %1479 = vmatprep.subr.mxu1 %v1826_v18 }
 0x2ac   :  { %1480 = vmatpush3.msra.mxu1 %v1826_v18 }
 0x2ad   :  { %1481 = vmatprep.subr.mxu1 %v1834_v19 }
 0x2ae   :  { %1482 = vmatpush3.msra.mxu1 %v1834_v19 }
 0x2af   :  { %1483 = vmatprep.subr.mxu1 %v1843_v20 }
 0x2b0   :  { %1484 = vmatpush3.msra.mxu1 %v1843_v20 }
 0x2b1   :  { %1485 = vmatprep.subr.mxu1 %v1852_v21 }
 0x2b2   :  { %1486 = vmatpush3.msra.mxu1 %v1852_v21 }
 0x2b3   :  { %1487 = vmatprep.subr.mxu1 %v1861_v22 }
 0x2b4   :  { %1488 = vmatpush3.msra.mxu1 %v1861_v22 }
 0x2b5   :  { %1489 = vmatprep.subr.mxu1 %v1870_v23 }
 0x2b6   :  { %1490 = vmatpush3.msra.mxu1 %v1870_v23 }
 0x2b7   :  { %1491 = vmatprep.subr.mxu1 %v1879_v24 }
 0x2b8   :  { %1492 = vmatpush3.msra.mxu1 %v1879_v24 }
 0x2b9   :  { %1493 = vmatprep.subr.mxu1 %v1888_v25 }
 0x2ba   :  { %1494 = vmatpush3.msra.mxu1 %v1888_v25 }
 0x2bb   :  { %1495 = vmatprep.subr.mxu1 %v1912_v26 }
 0x2bc   :  { %1496 = vmatpush3.msra.mxu1 %v1912_v26 }
 0x2bd   :  { %1497 = vmatprep.subr.mxu1 %v1920_v27 }
 0x2be   :  { %1498 = vmatpush3.msra.mxu1 %v1920_v27 }
 0x2bf   :  { %1551 = vmatprep.subr.mxu1 %v1776_v6 }
 0x35f   :  { %v2073_v28 = vpop.f32.mrf.mxu1 }
 0x360   :  { %v641_v31 = vmul.f32 %v2073_v28, %v2073_v28  ;;  %1464 = vmatprep.mubr.f32.mxu0 %v2073_v28 }
 0x361   :  { %v1430_v53 = vpop.f32.mrf.mxu1 }
 0x362   :  { %1499 = vmatprep.mubr.f32.mxu1 %v641_v31 }
 0x363   :  { %v2078_v54 = vpop.f32.mrf.mxu1 }
 0x364   :  { %v642_v55 = vmul.f32 %v2078_v54, %v2078_v54  ;;  %1465 = vmatmul.mubr.f32.vlgmr.msra.gmra.mxu0 %v2078_v54 }
 0x365   :  { %v1431_v57 = vpop.f32.mrf.mxu1  ;;  %1503 = vmatpush3.msra.mxu0 %v1974_v33 }
 0x366   :  { %1500 = vmatmul.mubr.f32.vlgmr.msra.gmra.mxu1 %v642_v55  ;;  %1504 = vmatprep.subr.mxu0 %v1979_v34 }
 0x367   :  { %1552 = vmatpush3.msra.mxu1 %v1776_v6  ;;  %1583 = vmatprep.mubr.f32.mxu1 %v926_v56 }
 0x368   :  { %1553 = vmatprep.subr.mxu1 %v1781_v7  ;;  %1505 = vmatpush3.msra.mxu0 %v1979_v34 }
 0x369   :  { %1554 = vmatpush3.msra.mxu1 %v1781_v7  ;;  %1506 = vmatprep.subr.mxu0 %v1987_v35 }
 0x36a   :  { %1555 = vmatprep.subr.mxu1 %v1794_v10  ;;  %1507 = vmatpush3.msra.mxu0 %v1987_v35 }
 0x36b   :  { %1556 = vmatpush3.msra.mxu1 %v1794_v10  ;;  %1508 = vmatprep.subr.mxu0 %v1994_v36 }
 0x36c   :  { %1557 = vmatprep.subr.mxu1 %v1804_v14  ;;  %1509 = vmatpush3.msra.mxu0 %v1994_v36 }
 0x36d   :  { %1558 = vmatpush3.msra.mxu1 %v1804_v14  ;;  %1516 = vmatprep.subr.mxu0 %v1776_v6 }
 0x36e   :  { %1559 = vmatprep.subr.mxu1 %v1809_v15 }
 0x36f   :  { %1560 = vmatpush3.msra.mxu1 %v1809_v15 }
 0x370   :  { %1561 = vmatprep.subr.mxu1 %v1816_v16 }
 0x371   :  { %1562 = vmatpush3.msra.mxu1 %v1816_v16 }
 0x372   :  { %1563 = vmatprep.subr.mxu1 %v1826_v18 }
 0x373   :  { %1564 = vmatpush3.msra.mxu1 %v1826_v18 }
 0x374   :  { %1565 = vmatprep.subr.mxu1 %v1834_v19 }
 0x375   :  { %1566 = vmatpush3.msra.mxu1 %v1834_v19 }
 0x376   :  { %1567 = vmatprep.subr.mxu1 %v1843_v20 }
 0x377   :  { %1568 = vmatpush3.msra.mxu1 %v1843_v20 }
 0x378   :  { %1569 = vmatprep.subr.mxu1 %v1852_v21 }
 0x379   :  { %1570 = vmatpush3.msra.mxu1 %v1852_v21 }
 0x37a   :  { %1571 = vmatprep.subr.mxu1 %v1861_v22 }
 0x37b   :  { %1572 = vmatpush3.msra.mxu1 %v1861_v22 }
 0x37c   :  { %1573 = vmatprep.subr.mxu1 %v1870_v23 }
 0x37d   :  { %1574 = vmatpush3.msra.mxu1 %v1870_v23 }
 0x37e   :  { %1575 = vmatprep.subr.mxu1 %v1879_v24 }
 0x37f   :  { %1576 = vmatpush3.msra.mxu1 %v1879_v24 }
 0x380   :  { %1577 = vmatprep.subr.mxu1 %v1888_v25 }
 0x381   :  { %1578 = vmatpush3.msra.mxu1 %v1888_v25 }
 0x382   :  { %1579 = vmatprep.subr.mxu1 %v1912_v26 }
 0x383   :  { %1580 = vmatpush3.msra.mxu1 %v1912_v26 }
 0x384   :  { %1581 = vmatprep.subr.mxu1 %v1920_v27 }
 0x385   :  { %1582 = vmatpush3.msra.mxu1 %v1920_v27 }
 0x386   :  { %1584 = vmatmul.mubr.f32.vlgmr.msra.gmra.mxu1 %v927_v58 }
 0x424   :  { %v1466_v59 = vpop.f32.mrf.mxu0 }
 0x425   :  { %v640_v60 = vmul.f32 0.25, %v1466_v59 }
 0x426   :  { %v630_v61 = vpop.f32.mrf.mxu0  ;;  %v1501_v62 = vpop.f32.mrf.mxu1 }
 0x427   :  { %v721_v63 = vmul.f32 %v640_v60, %v640_v60  ;;  %v639_v0 = vmul.f32 0.25, %v630_v61  ;;  %v719_v1 = vmul.f32 0.25, %v1501_v62  ;;  %v731_v42 = vsub.f32 0.0, %v640_v60 }
 0x428   :  { %v709_v2 = vpop.f32.mrf.mxu1  ;;  %v1118_v61 = vsub.s32 4, %v2031_v8 }
 0x429   :  { %v720_v3 = vmul.f32 %v639_v0, %v639_v0  ;;  %v723_v4 = vsub.f32 %v719_v1, %v721_v63  ;;  %v718_v5 = vmul.f32 0.25, %v709_v2  ;;  %v730_v32 = vsub.f32 0.0, %v639_v0 }
 0x42a   :  { %v1119_v62 = vrot.slane %v2034_v11, %v1118_v61  ;;  %v1126_v63 = vsub.s32 5, %v2031_v8 }
 0x42b   :  { %v725_v9 = vmax.f32 %v723_v4, 0.0  ;;  %v722_v12 = vsub.f32 %v718_v5, %v720_v3 }
 0x42c   :  { %v1127_v3 = vrot.slane %v2034_v11, %v1126_v63 }
 0x42d   :  { %v724_v13 = vmax.f32 %v722_v12, 0.0  ;;  %v727_v17 = vadd.f32 1e-05, %v725_v9 }
 0x42f   :  { %v726_v29 = vadd.f32 1e-05, %v724_v13 }
 0x431   :  { %1632 = vrsqrt.f32 %v726_v29 }
 0x432   :  { %1634 = vrsqrt.f32 %v727_v17 }
 0x43e   :  { %v1633_v39 = vpop.eup %1632 }
 0x43f   :  { %v1635_v40 = vpop.eup %1634  ;;  %1510 = vmatprep.mubr.msk.f32.mxu0 %vm340_vm1, %v1633_v39  ;;  %v732_v41 = vmul.f32 %v1633_v39, %v730_v32 }
 0x440   :  { %1511 = vmatmul.mubr.msk.f32.vlgmr.msra.gmra.mxu0 %vm340_vm1, %v1635_v40  ;;  %v733_v37 = vmul.f32 %v1635_v40, %v731_v42 }
 0x441   :  { %1517 = vmatpush3.msra.mxu0 %v1776_v6  ;;  %1513 = vmatprep.mubr.msk.f32.mxu0 %vm340_vm1, %v732_v41  ;;  %v833_v6 = vsub.s32 2, %v2031_v8 }
 0x442   :  { %1518 = vmatprep.subr.mxu0 %v1781_v7 }
 0x443   :  { %1519 = vmatpush3.msra.mxu0 %v1781_v7  ;;  %v834_v7 = vrot.slane %v2034_v11, %v833_v6 }
 0x444   :  { %1520 = vmatprep.subr.mxu0 %v1794_v10  ;;  %1514 = vmatmul.mubr.msk.f32.gmra.mxu0 %vm340_vm1, %v733_v37 }
 0x445   :  { %1521 = vmatpush3.msra.mxu0 %v1794_v10  ;;  %1548 = vmatprep.mubr.f32.mxu0 %v1933_v30  ;;  %v841_v10 = vsub.s32 3, %v2031_v8 }
 0x446   :  { %1522 = vmatprep.subr.mxu0 %v1804_v14 }
 0x447   :  { %1523 = vmatpush3.msra.mxu0 %v1804_v14 }
 0x448   :  { %1524 = vmatprep.subr.mxu0 %v1809_v15 }
 0x449   :  { %1525 = vmatpush3.msra.mxu0 %v1809_v15 }
 0x44a   :  { %1526 = vmatprep.subr.mxu0 %v1816_v16 }
 0x44b   :  { %1527 = vmatpush3.msra.mxu0 %v1816_v16 }
 0x44c   :  { %1528 = vmatprep.subr.mxu0 %v1826_v18 }
 0x44d   :  { %1529 = vmatpush3.msra.mxu0 %v1826_v18  ;;  %v842_v18 = vrot.slane %v2034_v11, %v841_v10 }
 0x44e   :  { %1530 = vmatprep.subr.mxu0 %v1834_v19 }
 0x44f   :  { %1531 = vmatpush3.msra.mxu0 %v1834_v19 }
 0x450   :  { %1532 = vmatprep.subr.mxu0 %v1843_v20 }
 0x451   :  { %1533 = vmatpush3.msra.mxu0 %v1843_v20 }
 0x452   :  { %1534 = vmatprep.subr.mxu0 %v1852_v21 }
 0x453   :  { %1535 = vmatpush3.msra.mxu0 %v1852_v21 }
 0x454   :  { %1536 = vmatprep.subr.mxu0 %v1861_v22 }
 0x455   :  { %1537 = vmatpush3.msra.mxu0 %v1861_v22 }
 0x456   :  { %1538 = vmatprep.subr.mxu0 %v1870_v23 }
 0x457   :  { %1539 = vmatpush3.msra.mxu0 %v1870_v23 }
 0x458   :  { %1540 = vmatprep.subr.mxu0 %v1879_v24 }
 0x459   :  { %1541 = vmatpush3.msra.mxu0 %v1879_v24 }
 0x45a   :  { %1542 = vmatprep.subr.mxu0 %v1888_v25 }
 0x45b   :  { %1543 = vmatpush3.msra.mxu0 %v1888_v25 }
 0x45c   :  { %1544 = vmatprep.subr.mxu0 %v1912_v26 }
 0x45d   :  { %1545 = vmatpush3.msra.mxu0 %v1912_v26 }
 0x45e   :  { %1546 = vmatprep.subr.mxu0 %v1920_v27 }
 0x45f   :  { %1547 = vmatpush3.msra.mxu0 %v1920_v27 }
 0x460   :  { %1549 = vmatmul.mubr.f32.vlgmr.msra.gmra.mxu0 %v2000_v38  ;;  %1586 = vmatprep.subr.mxu0 %v1974_v33 }
 0x461   :  { %1587 = vmatpush3.msra.mxu0 %v1974_v33 }
 0x462   :  { %1588 = vmatprep.subr.mxu0 %v1979_v34 }
 0x463   :  { %1589 = vmatpush3.msra.mxu0 %v1979_v34 }
 0x464   :  { %1590 = vmatprep.subr.mxu0 %v1987_v35 }
 0x465   :  { %1591 = vmatpush3.msra.mxu0 %v1987_v35  ;;  %v1585_v35 = vpop.f32.mrf.mxu1 }
 0x466   :  { %1592 = vmatprep.subr.mxu0 %v1994_v36  ;;  %v1004_v46 = vmul.f32 0.25, %v1585_v35 }
 0x467   :  { %1593 = vmatpush3.msra.mxu0 %v1994_v36  ;;  %v994_v44 = vpop.f32.mrf.mxu1 }
 0x468   :  { %v1003_v49 = vmul.f32 0.25, %v994_v44 }
 0x500   :  { %v1512_v14 = vpop.f32.mrf.mxu0 }
 0x501   :  { %v836_v16 = vmul.f32 %v1512_v14, %v834_v7 }
 0x502   :  { %v812_v15 = vpop.f32.mrf.mxu0 }
 0x503   :  { %v835_v20 = vmul.f32 %v834_v7, %v812_v15  ;;  %v846_v23 = vmul.f32 %v836_v16, %v2078_v54 }
 0x504   :  { %v1515_v19 = vpop.f32.mrf.mxu0 }
 0x505   :  { %v838_v21 = vmul.f32 %v1515_v19, %v834_v7  ;;  %v845_v26 = vmul.f32 %v835_v20, %v2073_v28 }
 0x506   :  { %v822_v22 = vpop.f32.mrf.mxu0 }
 0x507   :  { %v844_v24 = vadd.f32 %v842_v18, %v838_v21  ;;  %v837_v25 = vmul.f32 %v834_v7, %v822_v22 }
 0x509   :  { %v848_v27 = vadd.f32 %v846_v23, %v844_v24  ;;  %v843_v33 = vadd.f32 %v842_v18, %v837_v25 }
 0x50b   :  { %v847_v34 = vadd.f32 %v845_v26, %v843_v33 }
 0x520   :  { %v1550_v36 = vpop.f32.mrf.mxu0 }
 0x521   :  { %v925_v43 = vmul.f32 0.25, %v1550_v36 }
 0x522   :  { %v915_v45 = vpop.f32.mrf.mxu0 }
 0x523   :  { %v1006_v47 = vmul.f32 %v925_v43, %v925_v43  ;;  %v924_v48 = vmul.f32 0.25, %v915_v45  ;;  %v1016_v59 = vsub.f32 0.0, %v925_v43 }
 0x525   :  { %v1008_v50 = vsub.f32 %v1004_v46, %v1006_v47  ;;  %v1005_v51 = vmul.f32 %v924_v48, %v924_v48  ;;  %v1015_v28 = vsub.f32 0.0, %v924_v48 }
 0x527   :  { %v1010_v52 = vmax.f32 %v1008_v50, 0.0  ;;  %v1007_v31 = vsub.f32 %v1003_v49, %v1005_v51 }
 0x529   :  { %v1009_v53 = vmax.f32 %v1007_v31, 0.0  ;;  %v1012_v54 = vadd.f32 1e-05, %v1010_v52 }
 0x52b   :  { %v1011_v55 = vadd.f32 1e-05, %v1009_v53 }
 0x52d   :  { %1636 = vrsqrt.f32 %v1011_v55 }
 0x52e   :  { %1638 = vrsqrt.f32 %v1012_v54 }
 0x53a   :  { %v1637_v56 = vpop.eup %1636 }
 0x53b   :  { %v1639_v57 = vpop.eup %1638  ;;  %v1017_v58 = vmul.f32 %v1637_v56, %v1015_v28  ;;  %1594 = vmatprep.mubr.msk.f32.mxu0 %vm340_vm1, %v1637_v56 }
 0x53c   :  { %1595 = vmatmul.mubr.msk.f32.vlgmr.msra.gmra.mxu0 %vm340_vm1, %v1639_v57  ;;  %v1018_v60 = vmul.f32 %v1639_v57, %v1016_v59 }
 0x53d   :  { %1597 = vmatprep.mubr.msk.f32.mxu0 %vm340_vm1, %v1017_v58 }
 0x540   :  { %1598 = vmatmul.mubr.msk.f32.gmra.mxu0 %vm340_vm1, %v1018_v60 }
 0x5fc   :  { %v1596_v0 = vpop.f32.mrf.mxu0 }
 0x5fd   :  { %v1121_v2 = vmul.f32 %v1596_v0, %v1119_v62 }
 0x5fe   :  { %v1097_v1 = vpop.f32.mrf.mxu0 }
 0x5ff   :  { %v1120_v5 = vmul.f32 %v1119_v62, %v1097_v1  ;;  %v1131_v13 = vmul.f32 %v1121_v2, %v2000_v38 }
 0x600   :  { %v1599_v4 = vpop.f32.mrf.mxu0 }
 0x601   :  { %v1123_v9 = vmul.f32 %v1599_v4, %v1119_v62  ;;  %v1130_v32 = vmul.f32 %v1120_v5, %v1933_v30 }
 0x602   :  { %v1107_v12 = vpop.f32.mrf.mxu0 }
 0x603   :  { %v1129_v17 = vadd.f32 %v1127_v3, %v1123_v9  ;;  %v1122_v29 = vmul.f32 %v1119_v62, %v1107_v12 }
 0x605   :  { %v1133_v39 = vadd.f32 %v1131_v13, %v1129_v17  ;;  %v1128_v40 = vadd.f32 %v1127_v3, %v1122_v29 }
 0x607   :  { %v1132_v41 = vadd.f32 %v1130_v32, %v1128_v40  ;;  %v1135_v42 = vadd.f32 %v1133_v39, %v848_v27 }
 0x609   :  { %v1134_v8 = vadd.f32 %v1132_v41, %v847_v34  ;;  %v1137_v37 = vmax.f32 %v1135_v42, 0.0 }
 0x60b   :  { %v1136_v6 = vmax.f32 %v1134_v8, 0.0  ;;  %1139 = vst [vmem:[#allocation7 + $0x8] sm:$0xff] %v1137_v37 }
 0x60d   :  { %1138 = vst [vmem:[#allocation7] sm:$0xff] %v1136_v6 }
 0x60e   :  { %1691 = shalt.err (!%p1688_p0)
}
 0x60f   :  { %1151 = dma.vmem_to_hbm [thread:$0]  %s1146_s29, 256, %s2199_s6, [#allocation4], %s1707_s24, %s1707_s24, %s1708_s25  }
 0x610   :  { %1704 = dma.done.wait [#allocation4], 256  }
 0x611   :  { %1705 = vsyncadd [#allocation4], 4294967040 }
 0x612   :  { %1155 = vsyncpa [#allocation3], 1 }
 0x613   :  { %1156 = vsyncpa [#allocation6], 1 }
 0x614   :  { %1157 = vsyncpa [#allocation4], 1 }

</bundles_post_ra>
